<compile_context>
chip_gen: v7x
topology: tpu7x:2x2x1
jax: 0.10.0
libtpu: 0.0.40
codegen_flags: <defaults>
</compile_context>

<pallas_src>
import functools

import numpy as np

import jax
import jax.numpy as jnp
from jax import lax
from jax.experimental import pallas as pl
from jax.experimental.pallas import tpu as pltpu

LANES = 128
BT = 8  # batch rows per grid step (also the sublane alignment unit)


# ------------------------------- Pallas kernel ------------------------------- #

def cnn_kernel(x_ref, r1_ref, b1_ref, r2_ref, b2_ref, rf1_ref, fb1_ref,
               f2_ref, fb2_ref, f3_ref, fb3_ref, o_ref, *, num_classes):
    f32 = jnp.float32
    bt = o_ref.shape[0]                       # 8
    x = x_ref[0]                              # (2, 16*bt, 128) bf16; rows=(h//2, b), lanes=w*3+c

    # ---- conv1 (3->6, 5x5) + bias + relu + 2x2 maxpool ------------------------
    # z0/z1 are the even/odd conv-output-row slabs: rows=(h1, b), lanes=pw*128+w1*6+c.
    z0 = jnp.zeros((14 * bt, 256), f32)
    z1 = jnp.zeros((14 * bt, 256), f32)
    for kh in range(5):
        w = r1_ref[kh]                                        # (128, 256) bf16
        p0, o0 = kh % 2, (kh // 2) * bt                       # ph = 0 slab
        p1, o1 = (kh + 1) % 2, ((kh + 1) // 2) * bt           # ph = 1 slab
        z0 = z0 + jnp.dot(x[p0, o0:o0 + 14 * bt, :], w, preferred_element_type=f32)
        z1 = z1 + jnp.dot(x[p1, o1:o1 + 14 * bt, :], w, preferred_element_type=f32)
    y1 = jnp.maximum(jnp.maximum(z0, z1) + b1_ref[...], 0.0)  # row pool + bias + relu
    y1 = jnp.maximum(y1[:, :128], y1[:, 128:])                # width pool (lane halves)
    y1 = y1.astype(r2_ref.dtype)                              # (14*bt, 128); lanes = w1*6+c

    # ---- conv2 (6->16, 5x5) + bias + relu + width pool -------------------------
    z2 = jnp.zeros((10 * bt, 256), f32)
    for kh in range(5):
        z2 = z2 + jnp.dot(y1[kh * bt:(kh + 10) * bt, :], r2_ref[kh],
                          preferred_element_type=f32)
    z2 = jnp.maximum(z2 + b2_ref[...], 0.0)                   # rows=(ho2,b), lanes=pw*128+wp*16+c
    z2 = jnp.maximum(z2[:, :128], z2[:, 128:])                # width pool -> lanes = wp*16+c

    # ---- height pool + flatten + fc1 as 5 accumulated aligned dots -------------
    h = jnp.zeros((bt, 128), f32)
    for hp in range(5):
        a = z2[(2 * hp) * bt:(2 * hp + 1) * bt, :]
        b = z2[(2 * hp + 1) * bt:(2 * hp + 2) * bt, :]
        pooled = jnp.maximum(a, b).astype(rf1_ref.dtype)      # (bt, 128)
        h = h + jnp.dot(pooled, rf1_ref[hp], preferred_element_type=f32)
    h = jnp.maximum(h + fb1_ref[...], 0.0)

    # ---- fc2 + relu, fc3, masked log_softmax -----------------------------------
    h = jnp.maximum(jnp.dot(h.astype(f2_ref.dtype), f2_ref[...],
                            preferred_element_type=f32) + fb2_ref[...], 0.0)
    zl = jnp.dot(h.astype(f3_ref.dtype), f3_ref[...],
                 preferred_element_type=f32) + fb3_ref[...]

    col = lax.broadcasted_iota(jnp.int32, zl.shape, 1)
    zm = jnp.where(col < num_classes, zl, -1e30)
    m = jnp.max(zm, axis=-1, keepdims=True)
    lse = m + jnp.log(jnp.sum(jnp.exp(zm - m), axis=-1, keepdims=True))
    o_ref[...] = zl - lse


# ---------------------- host-side (one-time) weight packing ------------------- #

def prepare_weights(params, num_classes):
    """Eager, host-side packing of PyTorch-layout weights into the structured,
    lane-aligned matmul operands the kernel consumes.  Call once, outside jit."""
    (w1, b1), (w2, b2), (fw1, fb1), (fw2, fb2), (fw3, fb3) = \
        [tuple(np.asarray(t, np.float32) for t in pair) for pair in params]

    # conv1 RHS: r1[kh, w0*3+ci, pw*128 + w1*6 + co] = w1[co, ci, kh, w0-(2*w1+pw)]
    r1 = np.zeros((5, 128, 256), np.float32)
    for kh in range(5):
        for kw in range(5):
            tap = w1[:, :, kh, kw].T                              # (ci=3, co=6)
            for pw in range(2):
                for w1i in range(14):
                    w0 = 2 * w1i + pw + kw
                    r1[kh, w0 * 3:w0 * 3 + 3,
                       pw * 128 + w1i * 6: pw * 128 + w1i * 6 + 6] = tap
    b1v = np.zeros((1, 256), np.float32)
    for pw in range(2):
        for w1i in range(14):
            b1v[0, pw * 128 + w1i * 6: pw * 128 + w1i * 6 + 6] = b1

    # conv2 RHS: r2[kh, w1*6+ci, pw*128 + wp*16 + co] = w2[co, ci, kh, w1-(2*wp+pw)]
    r2 = np.zeros((5, 128, 256), np.float32)
    for kh in range(5):
        for kw in range(5):
            tap = w2[:, :, kh, kw].T                              # (ci=6, co=16)
            for pw in range(2):
                for wp in range(5):
                    w1i = 2 * wp + pw + kw
                    r2[kh, w1i * 6:w1i * 6 + 6,
                       pw * 128 + wp * 16: pw * 128 + wp * 16 + 16] = tap
    b2v = np.zeros((1, 256), np.float32)
    for pw in range(2):
        for wp in range(5):
            b2v[0, pw * 128 + wp * 16: pw * 128 + wp * 16 + 16] = b2

    # fc1 split into 5 per-height-position chunks matching the in-kernel layout:
    # rf1[hp, wp*16+co, j] = fw1[j, co*25 + hp*5 + wp]   (PyTorch view(-1, 400) order)
    rf1 = np.zeros((5, 128, 128), np.float32)
    for hp in range(5):
        for wp in range(5):
            for co in range(16):
                rf1[hp, wp * 16 + co, :120] = fw1[:, co * 25 + hp * 5 + wp]
    fb1v = np.zeros((1, 128), np.float32); fb1v[0, :120] = fb1

    f2 = np.zeros((128, 128), np.float32); f2[:120, :84] = fw2.T
    fb2v = np.zeros((1, 128), np.float32); fb2v[0, :84] = fb2
    f3 = np.zeros((128, 128), np.float32); f3[:84, :num_classes] = fw3.T
    fb3v = np.zeros((1, 128), np.float32); fb3v[0, :num_classes] = fb3

    bf16 = jnp.bfloat16
    return (jnp.asarray(r1, bf16), jnp.asarray(b1v),
            jnp.asarray(r2, bf16), jnp.asarray(b2v),
            jnp.asarray(rf1, bf16), jnp.asarray(fb1v),
            jnp.asarray(f2, bf16), jnp.asarray(fb2v),
            jnp.asarray(f3, bf16), jnp.asarray(fb3v))


# ------------------------------ forward wrapper ------------------------------- #

def _full_spec(a):
    n = a.ndim
    return pl.BlockSpec(a.shape, lambda i: (0,) * n)


def cnn_cifar_forward(x, packed, num_classes):
    bsz = x.shape[0]
    bp = -(-bsz // BT) * BT
    nbt = bp // BT

    # Only per-step XLA glue: NCHW input -> rows=(h//2, b), lanes=w*3+c, split by
    # row parity and tiled by batch; ~12 KB at B=2, one fusion.
    xh = jnp.transpose(x, (2, 0, 3, 1)).reshape(32, bsz, 96)        # (h, b, w*3+c)
    xh = jnp.pad(xh, ((0, 0), (0, bp - bsz), (0, 0)))
    xh = xh.reshape(16, 2, nbt, BT, 96).transpose(2, 1, 0, 3, 4)    # (tile, par, h//2, b, lane)
    xps = jnp.pad(xh.reshape(nbt, 2, 16 * BT, 96),
                  ((0, 0), (0, 0), (0, 0), (0, 128 - 96))).astype(jnp.bfloat16)

    out = pl.pallas_call(
        functools.partial(cnn_kernel, num_classes=num_classes),
        out_shape=jax.ShapeDtypeStruct((bp, LANES), jnp.float32),
        grid=(nbt,),
        in_specs=[pl.BlockSpec((1, 2, 16 * BT, 128), lambda i: (i, 0, 0, 0))]
                 + [_full_spec(a) for a in packed],
        out_specs=pl.BlockSpec((BT, LANES), lambda i: (i, 0)),
        compiler_params=pltpu.CompilerParams(
            dimension_semantics=("parallel",)),
    )(xps, *packed)
    return out[:bsz, :num_classes]


# --------------------------------- reference ---------------------------------- #

def reference_forward(x, params):
    (w1, b1), (w2, b2), (fw1, fb1), (fw2, fb2), (fw3, fb3) = params

    def conv_relu_pool_ref(x_, w_, b_):
        y = lax.conv_general_dilated(x_, w_, (1, 1), "VALID",
                                     dimension_numbers=("NCHW", "OIHW", "NCHW"))
        y = jnp.maximum(y + b_[None, :, None, None], 0.0)
        return lax.reduce_window(y, -jnp.inf, lax.max, (1, 1, 2, 2), (1, 1, 2, 2), "VALID")

    y = conv_relu_pool_ref(x, w1, b1)
    y = conv_relu_pool_ref(y, w2, b2)
    y = y.reshape(y.shape[0], 400)
    y = jnp.maximum(y @ fw1.T + fb1, 0.0)
    y = jnp.maximum(y @ fw2.T + fb2, 0.0)
    z = y @ fw3.T + fb3
    return z - jax.scipy.special.logsumexp(z, axis=1, keepdims=True)


# ----------------------------------- main -------------------------------------- #

def init_params(key, num_classes):
    def uniform(k, shape, fan_in):
        bound = 1.0 / jnp.sqrt(fan_in)
        return jax.random.uniform(k, shape, jnp.float32, -bound, bound)

    ks = jax.random.split(key, 10)
    w1 = uniform(ks[0], (6, 3, 5, 5), 3 * 25);    b1 = uniform(ks[1], (6,), 3 * 25)
    w2 = uniform(ks[2], (16, 6, 5, 5), 6 * 25);   b2 = uniform(ks[3], (16,), 6 * 25)
    fw1 = uniform(ks[4], (120, 400), 400);        fb1 = uniform(ks[5], (120,), 400)
    fw2 = uniform(ks[6], (84, 120), 120);         fb2 = uniform(ks[7], (84,), 120)
    fw3 = uniform(ks[8], (num_classes, 84), 84);  fb3 = uniform(ks[9], (num_classes,), 84)
    return ((w1, b1), (w2, b2), (fw1, fb1), (fw2, fb2), (fw3, fb3))


if __name__ == "__main__":
    num_classes = 10
    key = jax.random.PRNGKey(0)
    k_x, k_p = jax.random.split(key)

    # CIFAR-shaped input (B, 3, 32, 32): required by the 16*5*5 flatten in the module.
    x = jax.random.normal(k_x, (2, 3, 32, 32), jnp.float32)
    params = init_params(k_p, num_classes)

    packed = prepare_weights(params, num_classes)     # one-time host-side packing
    fwd = jax.jit(functools.partial(cnn_cifar_forward, packed=packed,
                                    num_classes=num_classes))
    out = jax.block_until_ready(fwd(x))

    ref = jax.block_until_ready(reference_forward(x, params))
    assert out.shape == (2, num_classes)
    # bf16 MXU operands with f32 accumulation; compare to the f32 reference with a
    # correspondingly loose tolerance.
    assert jnp.allclose(out, ref, rtol=5e-2, atol=5e-2), "mismatch vs. reference"

    print("KERNEL_OK")
</pallas_src>

<mosaic_0001>
module attributes {stable_mosaic.version = 11 : i64} {
  func.func @cnn_kernel(%arg0: i32, %arg1: memref<1x2x128x128xbf16, #tpu.memory_space<vmem>>, %arg2: memref<5x128x256xbf16, #tpu.memory_space<vmem>>, %arg3: memref<1x256xf32, #tpu.memory_space<vmem>>, %arg4: memref<5x128x256xbf16, #tpu.memory_space<vmem>>, %arg5: memref<1x256xf32, #tpu.memory_space<vmem>>, %arg6: memref<5x128x128xbf16, #tpu.memory_space<vmem>>, %arg7: memref<1x128xf32, #tpu.memory_space<vmem>>, %arg8: memref<128x128xbf16, #tpu.memory_space<vmem>>, %arg9: memref<1x128xf32, #tpu.memory_space<vmem>>, %arg10: memref<128x128xbf16, #tpu.memory_space<vmem>>, %arg11: memref<1x128xf32, #tpu.memory_space<vmem>>, %arg12: memref<8x128xf32, #tpu.memory_space<vmem>>) attributes {dimension_semantics = [#tpu.dimension_semantics<parallel>], iteration_bounds = array<i64: 1>, scalar_prefetch = 0 : i64, scratch_operands = 0 : i64, tpu.core_type = #tpu.core_type<tc>, window_params = [{transform_indices = @transform_0, window_bounds = array<i64: 1, 2, 128, 128>}, {pipeline_mode = #tpu.pipeline_mode<synchronous>, transform_indices = @transform_1, window_bounds = array<i64: 5, 128, 256>}, {pipeline_mode = #tpu.pipeline_mode<synchronous>, transform_indices = @transform_2, window_bounds = array<i64: 1, 256>}, {pipeline_mode = #tpu.pipeline_mode<synchronous>, transform_indices = @transform_3, window_bounds = array<i64: 5, 128, 256>}, {pipeline_mode = #tpu.pipeline_mode<synchronous>, transform_indices = @transform_4, window_bounds = array<i64: 1, 256>}, {pipeline_mode = #tpu.pipeline_mode<synchronous>, transform_indices = @transform_5, window_bounds = array<i64: 5, 128, 128>}, {pipeline_mode = #tpu.pipeline_mode<synchronous>, transform_indices = @transform_6, window_bounds = array<i64: 1, 128>}, {pipeline_mode = #tpu.pipeline_mode<synchronous>, transform_indices = @transform_7, window_bounds = array<i64: 128, 128>}, {pipeline_mode = #tpu.pipeline_mode<synchronous>, transform_indices = @transform_8, window_bounds = array<i64: 1, 128>}, {pipeline_mode = #tpu.pipeline_mode<synchronous>, transform_indices = @transform_9, window_bounds = array<i64: 128, 128>}, {pipeline_mode = #tpu.pipeline_mode<synchronous>, transform_indices = @transform_10, window_bounds = array<i64: 1, 128>}, {transform_indices = @transform_11, window_bounds = array<i64: 8, 128>}]} {
    %c0 = arith.constant 0 : index
    %c0_0 = arith.constant 0 : index
    %c0_1 = arith.constant 0 : index
    %c0_2 = arith.constant 0 : index
    %0 = vector.load %arg1[%c0, %c0_0, %c0_1, %c0_2] : memref<1x2x128x128xbf16, #tpu.memory_space<vmem>>, vector<1x2x128x128xbf16>
    %1 = vector.shape_cast %0 : vector<1x2x128x128xbf16> to vector<2x128x128xbf16>
    %cst = arith.constant 0.000000e+00 : f32
    %2 = vector.broadcast %cst : f32 to vector<112x256xf32>
    %cst_3 = arith.constant 0.000000e+00 : f32
    %3 = vector.broadcast %cst_3 : f32 to vector<112x256xf32>
    %c0_4 = arith.constant 0 : index
    %c0_5 = arith.constant 0 : index
    %c0_6 = arith.constant 0 : index
    %4 = vector.load %arg2[%c0_4, %c0_5, %c0_6] : memref<5x128x256xbf16, #tpu.memory_space<vmem>>, vector<1x128x256xbf16>
    %5 = vector.shape_cast %4 : vector<1x128x256xbf16> to vector<128x256xbf16>
    %6 = vector.extract_strided_slice %1 {offsets = [0, 0, 0], sizes = [1, 112, 128], strides = [1, 1, 1]} : vector<2x128x128xbf16> to vector<1x112x128xbf16>
    %7 = vector.shape_cast %6 : vector<1x112x128xbf16> to vector<112x128xbf16>
    %cst_7 = arith.constant dense<0.000000e+00> : vector<112x256xf32>
    %8 = tpu.matmul %7, %5, %cst_7 {dimension_numbers = #tpu.dot_dimension_numbers<[1], [0], [0], [1], [0, 0, 1, 1], [], []>} : vector<112x128xbf16>, vector<128x256xbf16>, vector<112x256xf32> -> vector<112x256xf32>
    %9 = arith.addf %2, %8 : vector<112x256xf32>
    %10 = vector.extract_strided_slice %1 {offsets = [1, 0, 0], sizes = [1, 112, 128], strides = [1, 1, 1]} : vector<2x128x128xbf16> to vector<1x112x128xbf16>
    %11 = vector.shape_cast %10 : vector<1x112x128xbf16> to vector<112x128xbf16>
    %cst_8 = arith.constant dense<0.000000e+00> : vector<112x256xf32>
    %12 = tpu.matmul %11, %5, %cst_8 {dimension_numbers = #tpu.dot_dimension_numbers<[1], [0], [0], [1], [0, 0, 1, 1], [], []>} : vector<112x128xbf16>, vector<128x256xbf16>, vector<112x256xf32> -> vector<112x256xf32>
    %13 = arith.addf %3, %12 : vector<112x256xf32>
    %c1 = arith.constant 1 : index
    %c0_9 = arith.constant 0 : index
    %c0_10 = arith.constant 0 : index
    %14 = vector.load %arg2[%c1, %c0_9, %c0_10] : memref<5x128x256xbf16, #tpu.memory_space<vmem>>, vector<1x128x256xbf16>
    %15 = vector.shape_cast %14 : vector<1x128x256xbf16> to vector<128x256xbf16>
    %16 = vector.extract_strided_slice %1 {offsets = [1, 0, 0], sizes = [1, 112, 128], strides = [1, 1, 1]} : vector<2x128x128xbf16> to vector<1x112x128xbf16>
    %17 = vector.shape_cast %16 : vector<1x112x128xbf16> to vector<112x128xbf16>
    %cst_11 = arith.constant dense<0.000000e+00> : vector<112x256xf32>
    %18 = tpu.matmul %17, %15, %cst_11 {dimension_numbers = #tpu.dot_dimension_numbers<[1], [0], [0], [1], [0, 0, 1, 1], [], []>} : vector<112x128xbf16>, vector<128x256xbf16>, vector<112x256xf32> -> vector<112x256xf32>
    %19 = arith.addf %9, %18 : vector<112x256xf32>
    %20 = vector.extract_strided_slice %1 {offsets = [0, 8, 0], sizes = [1, 112, 128], strides = [1, 1, 1]} : vector<2x128x128xbf16> to vector<1x112x128xbf16>
    %21 = vector.shape_cast %20 : vector<1x112x128xbf16> to vector<112x128xbf16>
    %cst_12 = arith.constant dense<0.000000e+00> : vector<112x256xf32>
    %22 = tpu.matmul %21, %15, %cst_12 {dimension_numbers = #tpu.dot_dimension_numbers<[1], [0], [0], [1], [0, 0, 1, 1], [], []>} : vector<112x128xbf16>, vector<128x256xbf16>, vector<112x256xf32> -> vector<112x256xf32>
    %23 = arith.addf %13, %22 : vector<112x256xf32>
    %c2 = arith.constant 2 : index
    %c0_13 = arith.constant 0 : index
    %c0_14 = arith.constant 0 : index
    %24 = vector.load %arg2[%c2, %c0_13, %c0_14] : memref<5x128x256xbf16, #tpu.memory_space<vmem>>, vector<1x128x256xbf16>
    %25 = vector.shape_cast %24 : vector<1x128x256xbf16> to vector<128x256xbf16>
    %26 = vector.extract_strided_slice %1 {offsets = [0, 8, 0], sizes = [1, 112, 128], strides = [1, 1, 1]} : vector<2x128x128xbf16> to vector<1x112x128xbf16>
    %27 = vector.shape_cast %26 : vector<1x112x128xbf16> to vector<112x128xbf16>
    %cst_15 = arith.constant dense<0.000000e+00> : vector<112x256xf32>
    %28 = tpu.matmul %27, %25, %cst_15 {dimension_numbers = #tpu.dot_dimension_numbers<[1], [0], [0], [1], [0, 0, 1, 1], [], []>} : vector<112x128xbf16>, vector<128x256xbf16>, vector<112x256xf32> -> vector<112x256xf32>
    %29 = arith.addf %19, %28 : vector<112x256xf32>
    %30 = vector.extract_strided_slice %1 {offsets = [1, 8, 0], sizes = [1, 112, 128], strides = [1, 1, 1]} : vector<2x128x128xbf16> to vector<1x112x128xbf16>
    %31 = vector.shape_cast %30 : vector<1x112x128xbf16> to vector<112x128xbf16>
    %cst_16 = arith.constant dense<0.000000e+00> : vector<112x256xf32>
    %32 = tpu.matmul %31, %25, %cst_16 {dimension_numbers = #tpu.dot_dimension_numbers<[1], [0], [0], [1], [0, 0, 1, 1], [], []>} : vector<112x128xbf16>, vector<128x256xbf16>, vector<112x256xf32> -> vector<112x256xf32>
    %33 = arith.addf %23, %32 : vector<112x256xf32>
    %c3 = arith.constant 3 : index
    %c0_17 = arith.constant 0 : index
    %c0_18 = arith.constant 0 : index
    %34 = vector.load %arg2[%c3, %c0_17, %c0_18] : memref<5x128x256xbf16, #tpu.memory_space<vmem>>, vector<1x128x256xbf16>
    %35 = vector.shape_cast %34 : vector<1x128x256xbf16> to vector<128x256xbf16>
    %36 = vector.extract_strided_slice %1 {offsets = [1, 8, 0], sizes = [1, 112, 128], strides = [1, 1, 1]} : vector<2x128x128xbf16> to vector<1x112x128xbf16>
    %37 = vector.shape_cast %36 : vector<1x112x128xbf16> to vector<112x128xbf16>
    %cst_19 = arith.constant dense<0.000000e+00> : vector<112x256xf32>
    %38 = tpu.matmul %37, %35, %cst_19 {dimension_numbers = #tpu.dot_dimension_numbers<[1], [0], [0], [1], [0, 0, 1, 1], [], []>} : vector<112x128xbf16>, vector<128x256xbf16>, vector<112x256xf32> -> vector<112x256xf32>
    %39 = arith.addf %29, %38 : vector<112x256xf32>
    %40 = vector.extract_strided_slice %1 {offsets = [0, 16, 0], sizes = [1, 112, 128], strides = [1, 1, 1]} : vector<2x128x128xbf16> to vector<1x112x128xbf16>
    %41 = vector.shape_cast %40 : vector<1x112x128xbf16> to vector<112x128xbf16>
    %cst_20 = arith.constant dense<0.000000e+00> : vector<112x256xf32>
    %42 = tpu.matmul %41, %35, %cst_20 {dimension_numbers = #tpu.dot_dimension_numbers<[1], [0], [0], [1], [0, 0, 1, 1], [], []>} : vector<112x128xbf16>, vector<128x256xbf16>, vector<112x256xf32> -> vector<112x256xf32>
    %43 = arith.addf %33, %42 : vector<112x256xf32>
    %c4 = arith.constant 4 : index
    %c0_21 = arith.constant 0 : index
    %c0_22 = arith.constant 0 : index
    %44 = vector.load %arg2[%c4, %c0_21, %c0_22] : memref<5x128x256xbf16, #tpu.memory_space<vmem>>, vector<1x128x256xbf16>
    %45 = vector.shape_cast %44 : vector<1x128x256xbf16> to vector<128x256xbf16>
    %46 = vector.extract_strided_slice %1 {offsets = [0, 16, 0], sizes = [1, 112, 128], strides = [1, 1, 1]} : vector<2x128x128xbf16> to vector<1x112x128xbf16>
    %47 = vector.shape_cast %46 : vector<1x112x128xbf16> to vector<112x128xbf16>
    %cst_23 = arith.constant dense<0.000000e+00> : vector<112x256xf32>
    %48 = tpu.matmul %47, %45, %cst_23 {dimension_numbers = #tpu.dot_dimension_numbers<[1], [0], [0], [1], [0, 0, 1, 1], [], []>} : vector<112x128xbf16>, vector<128x256xbf16>, vector<112x256xf32> -> vector<112x256xf32>
    %49 = arith.addf %39, %48 : vector<112x256xf32>
    %50 = vector.extract_strided_slice %1 {offsets = [1, 16, 0], sizes = [1, 112, 128], strides = [1, 1, 1]} : vector<2x128x128xbf16> to vector<1x112x128xbf16>
    %51 = vector.shape_cast %50 : vector<1x112x128xbf16> to vector<112x128xbf16>
    %cst_24 = arith.constant dense<0.000000e+00> : vector<112x256xf32>
    %52 = tpu.matmul %51, %45, %cst_24 {dimension_numbers = #tpu.dot_dimension_numbers<[1], [0], [0], [1], [0, 0, 1, 1], [], []>} : vector<112x128xbf16>, vector<128x256xbf16>, vector<112x256xf32> -> vector<112x256xf32>
    %53 = arith.addf %43, %52 : vector<112x256xf32>
    %54 = arith.maximumf %49, %53 : vector<112x256xf32>
    %c0_25 = arith.constant 0 : index
    %c0_26 = arith.constant 0 : index
    %55 = vector.load %arg3[%c0_25, %c0_26] : memref<1x256xf32, #tpu.memory_space<vmem>>, vector<1x256xf32>
    %56 = vector.broadcast %55 : vector<1x256xf32> to vector<112x256xf32>
    %57 = arith.addf %54, %56 : vector<112x256xf32>
    %cst_27 = arith.constant 0.000000e+00 : f32
    %58 = vector.broadcast %cst_27 : f32 to vector<112x256xf32>
    %59 = arith.maximumf %57, %58 : vector<112x256xf32>
    %60 = vector.extract_strided_slice %59 {offsets = [0, 0], sizes = [112, 128], strides = [1, 1]} : vector<112x256xf32> to vector<112x128xf32>
    %61 = vector.extract_strided_slice %59 {offsets = [0, 128], sizes = [112, 128], strides = [1, 1]} : vector<112x256xf32> to vector<112x128xf32>
    %62 = arith.maximumf %60, %61 : vector<112x128xf32>
    %63 = arith.truncf %62 : vector<112x128xf32> to vector<112x128xbf16>
    %cst_28 = arith.constant 0.000000e+00 : f32
    %64 = vector.broadcast %cst_28 : f32 to vector<80x256xf32>
    %65 = vector.extract_strided_slice %63 {offsets = [0, 0], sizes = [80, 128], strides = [1, 1]} : vector<112x128xbf16> to vector<80x128xbf16>
    %c0_29 = arith.constant 0 : index
    %c0_30 = arith.constant 0 : index
    %c0_31 = arith.constant 0 : index
    %66 = vector.load %arg4[%c0_29, %c0_30, %c0_31] : memref<5x128x256xbf16, #tpu.memory_space<vmem>>, vector<1x128x256xbf16>
    %67 = vector.shape_cast %66 : vector<1x128x256xbf16> to vector<128x256xbf16>
    %cst_32 = arith.constant dense<0.000000e+00> : vector<80x256xf32>
    %68 = tpu.matmul %65, %67, %cst_32 {dimension_numbers = #tpu.dot_dimension_numbers<[1], [0], [0], [1], [0, 0, 1, 1], [], []>} : vector<80x128xbf16>, vector<128x256xbf16>, vector<80x256xf32> -> vector<80x256xf32>
    %69 = arith.addf %64, %68 : vector<80x256xf32>
    %70 = vector.extract_strided_slice %63 {offsets = [8, 0], sizes = [80, 128], strides = [1, 1]} : vector<112x128xbf16> to vector<80x128xbf16>
    %c1_33 = arith.constant 1 : index
    %c0_34 = arith.constant 0 : index
    %c0_35 = arith.constant 0 : index
    %71 = vector.load %arg4[%c1_33, %c0_34, %c0_35] : memref<5x128x256xbf16, #tpu.memory_space<vmem>>, vector<1x128x256xbf16>
    %72 = vector.shape_cast %71 : vector<1x128x256xbf16> to vector<128x256xbf16>
    %cst_36 = arith.constant dense<0.000000e+00> : vector<80x256xf32>
    %73 = tpu.matmul %70, %72, %cst_36 {dimension_numbers = #tpu.dot_dimension_numbers<[1], [0], [0], [1], [0, 0, 1, 1], [], []>} : vector<80x128xbf16>, vector<128x256xbf16>, vector<80x256xf32> -> vector<80x256xf32>
    %74 = arith.addf %69, %73 : vector<80x256xf32>
    %75 = vector.extract_strided_slice %63 {offsets = [16, 0], sizes = [80, 128], strides = [1, 1]} : vector<112x128xbf16> to vector<80x128xbf16>
    %c2_37 = arith.constant 2 : index
    %c0_38 = arith.constant 0 : index
    %c0_39 = arith.constant 0 : index
    %76 = vector.load %arg4[%c2_37, %c0_38, %c0_39] : memref<5x128x256xbf16, #tpu.memory_space<vmem>>, vector<1x128x256xbf16>
    %77 = vector.shape_cast %76 : vector<1x128x256xbf16> to vector<128x256xbf16>
    %cst_40 = arith.constant dense<0.000000e+00> : vector<80x256xf32>
    %78 = tpu.matmul %75, %77, %cst_40 {dimension_numbers = #tpu.dot_dimension_numbers<[1], [0], [0], [1], [0, 0, 1, 1], [], []>} : vector<80x128xbf16>, vector<128x256xbf16>, vector<80x256xf32> -> vector<80x256xf32>
    %79 = arith.addf %74, %78 : vector<80x256xf32>
    %80 = vector.extract_strided_slice %63 {offsets = [24, 0], sizes = [80, 128], strides = [1, 1]} : vector<112x128xbf16> to vector<80x128xbf16>
    %c3_41 = arith.constant 3 : index
    %c0_42 = arith.constant 0 : index
    %c0_43 = arith.constant 0 : index
    %81 = vector.load %arg4[%c3_41, %c0_42, %c0_43] : memref<5x128x256xbf16, #tpu.memory_space<vmem>>, vector<1x128x256xbf16>
    %82 = vector.shape_cast %81 : vector<1x128x256xbf16> to vector<128x256xbf16>
    %cst_44 = arith.constant dense<0.000000e+00> : vector<80x256xf32>
    %83 = tpu.matmul %80, %82, %cst_44 {dimension_numbers = #tpu.dot_dimension_numbers<[1], [0], [0], [1], [0, 0, 1, 1], [], []>} : vector<80x128xbf16>, vector<128x256xbf16>, vector<80x256xf32> -> vector<80x256xf32>
    %84 = arith.addf %79, %83 : vector<80x256xf32>
    %85 = vector.extract_strided_slice %63 {offsets = [32, 0], sizes = [80, 128], strides = [1, 1]} : vector<112x128xbf16> to vector<80x128xbf16>
    %c4_45 = arith.constant 4 : index
    %c0_46 = arith.constant 0 : index
    %c0_47 = arith.constant 0 : index
    %86 = vector.load %arg4[%c4_45, %c0_46, %c0_47] : memref<5x128x256xbf16, #tpu.memory_space<vmem>>, vector<1x128x256xbf16>
    %87 = vector.shape_cast %86 : vector<1x128x256xbf16> to vector<128x256xbf16>
    %cst_48 = arith.constant dense<0.000000e+00> : vector<80x256xf32>
    %88 = tpu.matmul %85, %87, %cst_48 {dimension_numbers = #tpu.dot_dimension_numbers<[1], [0], [0], [1], [0, 0, 1, 1], [], []>} : vector<80x128xbf16>, vector<128x256xbf16>, vector<80x256xf32> -> vector<80x256xf32>
    %89 = arith.addf %84, %88 : vector<80x256xf32>
    %c0_49 = arith.constant 0 : index
    %c0_50 = arith.constant 0 : index
    %90 = vector.load %arg5[%c0_49, %c0_50] : memref<1x256xf32, #tpu.memory_space<vmem>>, vector<1x256xf32>
    %91 = vector.broadcast %90 : vector<1x256xf32> to vector<80x256xf32>
    %92 = arith.addf %89, %91 : vector<80x256xf32>
    %cst_51 = arith.constant 0.000000e+00 : f32
    %93 = vector.broadcast %cst_51 : f32 to vector<80x256xf32>
    %94 = arith.maximumf %92, %93 : vector<80x256xf32>
    %95 = vector.extract_strided_slice %94 {offsets = [0, 0], sizes = [80, 128], strides = [1, 1]} : vector<80x256xf32> to vector<80x128xf32>
    %96 = vector.extract_strided_slice %94 {offsets = [0, 128], sizes = [80, 128], strides = [1, 1]} : vector<80x256xf32> to vector<80x128xf32>
    %97 = arith.maximumf %95, %96 : vector<80x128xf32>
    %cst_52 = arith.constant 0.000000e+00 : f32
    %98 = vector.broadcast %cst_52 : f32 to vector<8x128xf32>
    %99 = vector.extract_strided_slice %97 {offsets = [0, 0], sizes = [8, 128], strides = [1, 1]} : vector<80x128xf32> to vector<8x128xf32>
    %100 = vector.extract_strided_slice %97 {offsets = [8, 0], sizes = [8, 128], strides = [1, 1]} : vector<80x128xf32> to vector<8x128xf32>
    %101 = arith.maximumf %99, %100 : vector<8x128xf32>
    %102 = arith.truncf %101 : vector<8x128xf32> to vector<8x128xbf16>
    %c0_53 = arith.constant 0 : index
    %c0_54 = arith.constant 0 : index
    %c0_55 = arith.constant 0 : index
    %103 = vector.load %arg6[%c0_53, %c0_54, %c0_55] : memref<5x128x128xbf16, #tpu.memory_space<vmem>>, vector<1x128x128xbf16>
    %104 = vector.shape_cast %103 : vector<1x128x128xbf16> to vector<128x128xbf16>
    %cst_56 = arith.constant dense<0.000000e+00> : vector<8x128xf32>
    %105 = tpu.matmul %102, %104, %cst_56 {dimension_numbers = #tpu.dot_dimension_numbers<[1], [0], [0], [1], [0, 0, 1, 1], [], []>} : vector<8x128xbf16>, vector<128x128xbf16>, vector<8x128xf32> -> vector<8x128xf32>
    %106 = arith.addf %98, %105 : vector<8x128xf32>
    %107 = vector.extract_strided_slice %97 {offsets = [16, 0], sizes = [8, 128], strides = [1, 1]} : vector<80x128xf32> to vector<8x128xf32>
    %108 = vector.extract_strided_slice %97 {offsets = [24, 0], sizes = [8, 128], strides = [1, 1]} : vector<80x128xf32> to vector<8x128xf32>
    %109 = arith.maximumf %107, %108 : vector<8x128xf32>
    %110 = arith.truncf %109 : vector<8x128xf32> to vector<8x128xbf16>
    %c1_57 = arith.constant 1 : index
    %c0_58 = arith.constant 0 : index
    %c0_59 = arith.constant 0 : index
    %111 = vector.load %arg6[%c1_57, %c0_58, %c0_59] : memref<5x128x128xbf16, #tpu.memory_space<vmem>>, vector<1x128x128xbf16>
    %112 = vector.shape_cast %111 : vector<1x128x128xbf16> to vector<128x128xbf16>
    %cst_60 = arith.constant dense<0.000000e+00> : vector<8x128xf32>
    %113 = tpu.matmul %110, %112, %cst_60 {dimension_numbers = #tpu.dot_dimension_numbers<[1], [0], [0], [1], [0, 0, 1, 1], [], []>} : vector<8x128xbf16>, vector<128x128xbf16>, vector<8x128xf32> -> vector<8x128xf32>
    %114 = arith.addf %106, %113 : vector<8x128xf32>
    %115 = vector.extract_strided_slice %97 {offsets = [32, 0], sizes = [8, 128], strides = [1, 1]} : vector<80x128xf32> to vector<8x128xf32>
    %116 = vector.extract_strided_slice %97 {offsets = [40, 0], sizes = [8, 128], strides = [1, 1]} : vector<80x128xf32> to vector<8x128xf32>
    %117 = arith.maximumf %115, %116 : vector<8x128xf32>
    %118 = arith.truncf %117 : vector<8x128xf32> to vector<8x128xbf16>
    %c2_61 = arith.constant 2 : index
    %c0_62 = arith.constant 0 : index
    %c0_63 = arith.constant 0 : index
    %119 = vector.load %arg6[%c2_61, %c0_62, %c0_63] : memref<5x128x128xbf16, #tpu.memory_space<vmem>>, vector<1x128x128xbf16>
    %120 = vector.shape_cast %119 : vector<1x128x128xbf16> to vector<128x128xbf16>
    %cst_64 = arith.constant dense<0.000000e+00> : vector<8x128xf32>
    %121 = tpu.matmul %118, %120, %cst_64 {dimension_numbers = #tpu.dot_dimension_numbers<[1], [0], [0], [1], [0, 0, 1, 1], [], []>} : vector<8x128xbf16>, vector<128x128xbf16>, vector<8x128xf32> -> vector<8x128xf32>
    %122 = arith.addf %114, %121 : vector<8x128xf32>
    %123 = vector.extract_strided_slice %97 {offsets = [48, 0], sizes = [8, 128], strides = [1, 1]} : vector<80x128xf32> to vector<8x128xf32>
    %124 = vector.extract_strided_slice %97 {offsets = [56, 0], sizes = [8, 128], strides = [1, 1]} : vector<80x128xf32> to vector<8x128xf32>
    %125 = arith.maximumf %123, %124 : vector<8x128xf32>
    %126 = arith.truncf %125 : vector<8x128xf32> to vector<8x128xbf16>
    %c3_65 = arith.constant 3 : index
    %c0_66 = arith.constant 0 : index
    %c0_67 = arith.constant 0 : index
    %127 = vector.load %arg6[%c3_65, %c0_66, %c0_67] : memref<5x128x128xbf16, #tpu.memory_space<vmem>>, vector<1x128x128xbf16>
    %128 = vector.shape_cast %127 : vector<1x128x128xbf16> to vector<128x128xbf16>
    %cst_68 = arith.constant dense<0.000000e+00> : vector<8x128xf32>
    %129 = tpu.matmul %126, %128, %cst_68 {dimension_numbers = #tpu.dot_dimension_numbers<[1], [0], [0], [1], [0, 0, 1, 1], [], []>} : vector<8x128xbf16>, vector<128x128xbf16>, vector<8x128xf32> -> vector<8x128xf32>
    %130 = arith.addf %122, %129 : vector<8x128xf32>
    %131 = vector.extract_strided_slice %97 {offsets = [64, 0], sizes = [8, 128], strides = [1, 1]} : vector<80x128xf32> to vector<8x128xf32>
    %132 = vector.extract_strided_slice %97 {offsets = [72, 0], sizes = [8, 128], strides = [1, 1]} : vector<80x128xf32> to vector<8x128xf32>
    %133 = arith.maximumf %131, %132 : vector<8x128xf32>
    %134 = arith.truncf %133 : vector<8x128xf32> to vector<8x128xbf16>
    %c4_69 = arith.constant 4 : index
    %c0_70 = arith.constant 0 : index
    %c0_71 = arith.constant 0 : index
    %135 = vector.load %arg6[%c4_69, %c0_70, %c0_71] : memref<5x128x128xbf16, #tpu.memory_space<vmem>>, vector<1x128x128xbf16>
    %136 = vector.shape_cast %135 : vector<1x128x128xbf16> to vector<128x128xbf16>
    %cst_72 = arith.constant dense<0.000000e+00> : vector<8x128xf32>
    %137 = tpu.matmul %134, %136, %cst_72 {dimension_numbers = #tpu.dot_dimension_numbers<[1], [0], [0], [1], [0, 0, 1, 1], [], []>} : vector<8x128xbf16>, vector<128x128xbf16>, vector<8x128xf32> -> vector<8x128xf32>
    %138 = arith.addf %130, %137 : vector<8x128xf32>
    %c0_73 = arith.constant 0 : index
    %c0_74 = arith.constant 0 : index
    %139 = vector.load %arg7[%c0_73, %c0_74] : memref<1x128xf32, #tpu.memory_space<vmem>>, vector<1x128xf32>
    %140 = vector.broadcast %139 : vector<1x128xf32> to vector<8x128xf32>
    %141 = arith.addf %138, %140 : vector<8x128xf32>
    %cst_75 = arith.constant 0.000000e+00 : f32
    %142 = vector.broadcast %cst_75 : f32 to vector<8x128xf32>
    %143 = arith.maximumf %141, %142 : vector<8x128xf32>
    %144 = arith.truncf %143 : vector<8x128xf32> to vector<8x128xbf16>
    %c0_76 = arith.constant 0 : index
    %c0_77 = arith.constant 0 : index
    %145 = vector.load %arg8[%c0_76, %c0_77] : memref<128x128xbf16, #tpu.memory_space<vmem>>, vector<128x128xbf16>
    %cst_78 = arith.constant dense<0.000000e+00> : vector<8x128xf32>
    %146 = tpu.matmul %144, %145, %cst_78 {dimension_numbers = #tpu.dot_dimension_numbers<[1], [0], [0], [1], [0, 0, 1, 1], [], []>} : vector<8x128xbf16>, vector<128x128xbf16>, vector<8x128xf32> -> vector<8x128xf32>
    %c0_79 = arith.constant 0 : index
    %c0_80 = arith.constant 0 : index
    %147 = vector.load %arg9[%c0_79, %c0_80] : memref<1x128xf32, #tpu.memory_space<vmem>>, vector<1x128xf32>
    %148 = vector.broadcast %147 : vector<1x128xf32> to vector<8x128xf32>
    %149 = arith.addf %146, %148 : vector<8x128xf32>
    %cst_81 = arith.constant 0.000000e+00 : f32
    %150 = vector.broadcast %cst_81 : f32 to vector<8x128xf32>
    %151 = arith.maximumf %149, %150 : vector<8x128xf32>
    %152 = arith.truncf %151 : vector<8x128xf32> to vector<8x128xbf16>
    %c0_82 = arith.constant 0 : index
    %c0_83 = arith.constant 0 : index
    %153 = vector.load %arg10[%c0_82, %c0_83] : memref<128x128xbf16, #tpu.memory_space<vmem>>, vector<128x128xbf16>
    %cst_84 = arith.constant dense<0.000000e+00> : vector<8x128xf32>
    %154 = tpu.matmul %152, %153, %cst_84 {dimension_numbers = #tpu.dot_dimension_numbers<[1], [0], [0], [1], [0, 0, 1, 1], [], []>} : vector<8x128xbf16>, vector<128x128xbf16>, vector<8x128xf32> -> vector<8x128xf32>
    %c0_85 = arith.constant 0 : index
    %c0_86 = arith.constant 0 : index
    %155 = vector.load %arg11[%c0_85, %c0_86] : memref<1x128xf32, #tpu.memory_space<vmem>>, vector<1x128xf32>
    %156 = vector.broadcast %155 : vector<1x128xf32> to vector<8x128xf32>
    %157 = arith.addf %154, %156 : vector<8x128xf32>
    %158 = tpu.iota {dimensions = array<i32: 1>} : vector<8x128xi32>
    %c10_i32 = arith.constant 10 : i32
    %159 = vector.broadcast %c10_i32 : i32 to vector<8x128xi32>
    %160 = arith.cmpi slt, %158, %159 : vector<8x128xi32>
    %cst_87 = arith.constant -1.000000e+30 : f32
    %161 = vector.broadcast %cst_87 : f32 to vector<8x128xf32>
    %162 = arith.select %160, %157, %161 : vector<8x128xi1>, vector<8x128xf32>
    %cst_88 = arith.constant dense<0xFF800000> : vector<8xf32>
    %163 = vector.multi_reduction <maximumf>, %162, %cst_88 [1] : vector<8x128xf32> to vector<8xf32>
    %164 = vector.shape_cast %163 : vector<8xf32> to vector<8x1xf32>
    %165 = vector.broadcast %164 : vector<8x1xf32> to vector<8x128xf32>
    %166 = arith.subf %162, %165 : vector<8x128xf32>
    %167 = math.exp %166 : vector<8x128xf32>
    %cst_89 = arith.constant dense<0.000000e+00> : vector<8xf32>
    %168 = vector.multi_reduction <add>, %167, %cst_89 [1] : vector<8x128xf32> to vector<8xf32>
    %169 = vector.shape_cast %168 : vector<8xf32> to vector<8x1xf32>
    %170 = math.log %169 : vector<8x1xf32>
    %171 = arith.addf %164, %170 : vector<8x1xf32>
    %172 = vector.broadcast %171 : vector<8x1xf32> to vector<8x128xf32>
    %173 = arith.subf %157, %172 : vector<8x128xf32>
    %c0_90 = arith.constant 0 : index
    %c0_91 = arith.constant 0 : index
    %174 = vector.load %arg12[%c0_90, %c0_91] : memref<8x128xf32, #tpu.memory_space<vmem>>, vector<8x128xf32>
    tpu.vector_store %arg12[%c0_90, %c0_91], %173 {strides = array<i32>} : memref<8x128xf32, #tpu.memory_space<vmem>>, vector<8x128xf32>,
    return
  }
  func.func @transform_0(%arg0: i32) -> (i32, i32, i32, i32) {
    %c0_i32 = arith.constant 0 : i32
    %c0_i32_0 = arith.constant 0 : i32
    %c0_i32_1 = arith.constant 0 : i32
    %c0_i32_2 = arith.constant 0 : i32
    return %arg0, %c0_i32, %c0_i32_0, %c0_i32_1 : i32, i32, i32, i32
  }
  func.func @transform_1(%arg0: i32) -> (i32, i32, i32) {
    %c0_i32 = arith.constant 0 : i32
    %c0_i32_0 = arith.constant 0 : i32
    %c0_i32_1 = arith.constant 0 : i32
    %c0_i32_2 = arith.constant 0 : i32
    return %c0_i32, %c0_i32_0, %c0_i32_1 : i32, i32, i32
  }
  func.func @transform_2(%arg0: i32) -> (i32, i32) {
    %c0_i32 = arith.constant 0 : i32
    %c0_i32_0 = arith.constant 0 : i32
    %c0_i32_1 = arith.constant 0 : i32
    return %c0_i32, %c0_i32_0 : i32, i32
  }
  func.func @transform_3(%arg0: i32) -> (i32, i32, i32) {
    %c0_i32 = arith.constant 0 : i32
    %c0_i32_0 = arith.constant 0 : i32
    %c0_i32_1 = arith.constant 0 : i32
    %c0_i32_2 = arith.constant 0 : i32
    return %c0_i32, %c0_i32_0, %c0_i32_1 : i32, i32, i32
  }
  func.func @transform_4(%arg0: i32) -> (i32, i32) {
    %c0_i32 = arith.constant 0 : i32
    %c0_i32_0 = arith.constant 0 : i32
    %c0_i32_1 = arith.constant 0 : i32
    return %c0_i32, %c0_i32_0 : i32, i32
  }
  func.func @transform_5(%arg0: i32) -> (i32, i32, i32) {
    %c0_i32 = arith.constant 0 : i32
    %c0_i32_0 = arith.constant 0 : i32
    %c0_i32_1 = arith.constant 0 : i32
    %c0_i32_2 = arith.constant 0 : i32
    return %c0_i32, %c0_i32_0, %c0_i32_1 : i32, i32, i32
  }
  func.func @transform_6(%arg0: i32) -> (i32, i32) {
    %c0_i32 = arith.constant 0 : i32
    %c0_i32_0 = arith.constant 0 : i32
    %c0_i32_1 = arith.constant 0 : i32
    return %c0_i32, %c0_i32_0 : i32, i32
  }
  func.func @transform_7(%arg0: i32) -> (i32, i32) {
    %c0_i32 = arith.constant 0 : i32
    %c0_i32_0 = arith.constant 0 : i32
    %c0_i32_1 = arith.constant 0 : i32
    return %c0_i32, %c0_i32_0 : i32, i32
  }
  func.func @transform_8(%arg0: i32) -> (i32, i32) {
    %c0_i32 = arith.constant 0 : i32
    %c0_i32_0 = arith.constant 0 : i32
    %c0_i32_1 = arith.constant 0 : i32
    return %c0_i32, %c0_i32_0 : i32, i32
  }
  func.func @transform_9(%arg0: i32) -> (i32, i32) {
    %c0_i32 = arith.constant 0 : i32
    %c0_i32_0 = arith.constant 0 : i32
    %c0_i32_1 = arith.constant 0 : i32
    return %c0_i32, %c0_i32_0 : i32, i32
  }
  func.func @transform_10(%arg0: i32) -> (i32, i32) {
    %c0_i32 = arith.constant 0 : i32
    %c0_i32_0 = arith.constant 0 : i32
    %c0_i32_1 = arith.constant 0 : i32
    return %c0_i32, %c0_i32_0 : i32, i32
  }
  func.func @transform_11(%arg0: i32) -> (i32, i32) {
    %c0_i32 = arith.constant 0 : i32
    %c0_i32_0 = arith.constant 0 : i32
    return %arg0, %c0_i32 : i32, i32
  }
}

</mosaic_0001>

<bundles_post_ra>
// kernel: cnn_cifar_forward.1
= control target key start
LH: loop header
LB: loop body
LE: loop exit
PB: predicated region body
PF: predicated region fallthrough
CT: control target
= control target key end

     0   :  { %v5114_v1 = vmov 0   ;;  %vm2033_vm0 = vcmask 1043456   ;;  %vm5116_vm1 = vmmov 0   ;;  %s6443_s1 = inlined_call_operand.vmem [shape: bf16[5,128,256], index: 1, kind: input, shape index: {}]   ;;  %s6444_s0 = inlined_call_operand.vmem [shape: bf16[1,2,128,128], index: 0, kind: input, shape index: {}]   ;;  %s6445_s3 = inlined_call_operand.vmem [shape: bf16[5,128,256], index: 3, kind: input, shape index: {}]   ;;  %s6446_s2 = inlined_call_operand.vmem [shape: f32[1,256], index: 2, kind: input, shape index: {}]   ;;  %s6447_s5 = inlined_call_operand.vmem [shape: bf16[5,128,128], index: 5, kind: input, shape index: {}]   ;;  %s6448_s4 = inlined_call_operand.vmem [shape: f32[1,256], index: 4, kind: input, shape index: {}]   ;;  %s6449_s7 = inlined_call_operand.vmem [shape: bf16[128,128], index: 7, kind: input, shape index: {}]   ;;  %s6450_s9 = inlined_call_operand.vmem [shape: bf16[128,128], index: 9, kind: input, shape index: {}]   ;;  %s6451_s6 = inlined_call_operand.vmem [shape: f32[1,128], index: 6, kind: input, shape index: {}]   ;;  %s6452_s8 = inlined_call_operand.vmem [shape: f32[1,128], index: 8, kind: input, shape index: {}]   ;;  %s6453_s10 = inlined_call_operand.vmem [shape: f32[1,128], index: 10, kind: input, shape index: {}]   ;;  %s6454_s11 = inlined_call_operand.vmem [shape: f32[8,128], index: 11, kind: output, shape index: {}]  }
   0x1   :  { %v4784_v0 = vld [vmem:[%s6443_s1 + $0x84] ss:$8 sps:$4 sm:$0xff]   ;;  %258 = vmatprep.mubr.bf16.mxu0 %v5114_v1  ;;  %602 = vmatprep.mubr.bf16.mxu1 %v5114_v1  ;;  %v4786_v2 = vld [vmem:[%s6443_s1 + $0x80] ss:$8 sps:$4 sm:$0xff]   ;;  %v4787_v3 = vld [vmem:[%s6443_s1 + $0x94] ss:$8 sps:$4 sm:$0xff]  }
   0x2   :  { %226 = vmatprep.subr.bf16.mxu0 %v4784_v0  ;;  %570 = vmatprep.subr.bf16.mxu1 %v4784_v0  ;;  %v4789_v4 = vld [vmem:[%s6443_s1 + $0x90] ss:$8 sps:$4 sm:$0xff]   ;;  %v4790_v5 = vld [vmem:[%s6443_s1 + $0xa4] ss:$8 sps:$4 sm:$0xff]   ;;  %v4792_v6 = vld [vmem:[%s6443_s1 + $0xa0] ss:$8 sps:$4 sm:$0xff]  }
   0x3   :  { %227 = vmatpush1.bf16.msra.mxu0 %v4786_v2  ;;  %571 = vmatpush1.bf16.msra.mxu1 %v4786_v2  ;;  %v4793_v7 = vld [vmem:[%s6443_s1 + $0xb4] ss:$8 sps:$4 sm:$0xff]   ;;  %v4795_v8 = vld [vmem:[%s6443_s1 + $0xb0] ss:$8 sps:$4 sm:$0xff]   ;;  %v4796_v9 = vld [vmem:[%s6443_s1 + $0xc4] ss:$8 sps:$4 sm:$0xff]  }
   0x4   :  { %228 = vmatprep.subr.bf16.mxu0 %v4787_v3  ;;  %572 = vmatprep.subr.bf16.mxu1 %v4787_v3  ;;  %v4798_v10 = vld [vmem:[%s6443_s1 + $0xc0] ss:$8 sps:$4 sm:$0xff]   ;;  %v56_v11 = vld [vmem:[%s6444_s0 + $0x44] sm:$0xf]  ;;  %v4799_v13 = vld [vmem:[%s6443_s1 + $0xd4] ss:$8 sps:$4 sm:$0xff]  }
   0x5   :  { %v57_v12 = vld [vmem:[%s6444_s0 + $0x48] sm:$0xf]  ;;  %v4801_v15 = vld [vmem:[%s6443_s1 + $0xd0] ss:$8 sps:$4 sm:$0xff]   ;;  %v4802_v16 = vld [vmem:[%s6443_s1 + $0xe4] ss:$8 sps:$4 sm:$0xff]  }
   0x6   :  { %v5218_v14 = vcombine.low %v56_v11, %v57_v12  ;;  %v4804_v17 = vld [vmem:[%s6443_s1 + $0xe0] ss:$8 sps:$4 sm:$0xff]   ;;  %v58_v18 = vld [vmem:[%s6444_s0 + $0x4c] sm:$0xf]  ;;  %v59_v19 = vld [vmem:[%s6444_s0 + $0x50] sm:$0xf] }
   0x7   :  { %229 = vmatpush1.bf16.msra.mxu0 %v4789_v4  ;;  %573 = vmatpush1.bf16.msra.mxu1 %v4789_v4  ;;  %v4805_v20 = vld [vmem:[%s6443_s1 + $0xf4] ss:$8 sps:$4 sm:$0xff]   ;;  %v5238_v21 = vcombine.low %v58_v18, %v59_v19  ;;  %v4807_v22 = vld [vmem:[%s6443_s1 + $0xf0] ss:$8 sps:$4 sm:$0xff]   ;;  %v55_v23 = vld [vmem:[%s6444_s0 + $0x40] sm:$0xf]  ;;  %v5302_v38 = vcombine.low %v57_v12, %v58_v18 }
   0x8   :  { %230 = vmatprep.subr.bf16.mxu0 %v4790_v5  ;;  %574 = vmatprep.subr.bf16.mxu1 %v4790_v5  ;;  %v5249_v24 = vld [vmem:[%s6444_s0 + $0x4] sm:$0xf]  ;;  %v5254_v25 = vld [vmem:[%s6444_s0 + $0x8] sm:$0xf]  ;;  %v5259_v27 = vcombine.low %v55_v23, %v56_v11  ;;  %v60_v30 = vld [vmem:[%s6444_s0 + $0x54] sm:$0xf] }
   0x9   :  { %v4811_v26 = vld [vmem:[%s6443_s1 + $0x4] ss:$8 sps:$4 sm:$0xff]   ;;  %v4809_v28 = vld [vmem:[%s6443_s1] ss:$8 sps:$4 sm:$0xff]   ;;  %v5266_v29 = vcombine.low %v5249_v24, %v5254_v25  ;;  %v5274_v31 = vld [vmem:[%s6444_s0 + $0x58] sm:$0xf]  ;;  %v5345_v49 = vcombine.low %v59_v19, %v60_v30 }
   0xa   :  { %v4816_v32 = vld [vmem:[%s6443_s1 + $0x14] ss:$8 sps:$4 sm:$0xff]   ;;  %v5280_v33 = vcombine.low %v60_v30, %v5274_v31  ;;  %v4814_v34 = vld [vmem:[%s6443_s1 + $0x10] ss:$8 sps:$4 sm:$0xff]   ;;  %v5290_v35 = vld [vmem:[%s6444_s0 + $0xc] sm:$0xf] }
   0xb   :  { %231 = vmatpush1.bf16.msra.mxu0 %v4792_v6  ;;  %575 = vmatpush1.bf16.msra.mxu1 %v4792_v6  ;;  %v5295_v36 = vld [vmem:[%s6444_s0 + $0x10] sm:$0xf]  ;;  %v4822_v37 = vld [vmem:[%s6443_s1 + $0x24] ss:$8 sps:$4 sm:$0xff]   ;;  %v4820_v40 = vld [vmem:[%s6443_s1 + $0x20] ss:$8 sps:$4 sm:$0xff]   ;;  %v5504_v30 = vcombine.low %v5254_v25, %v5290_v35 }
   0xc   :  { %232 = vmatprep.subr.bf16.mxu0 %v4793_v7  ;;  %576 = vmatprep.subr.bf16.mxu1 %v4793_v7  ;;  %v5306_v39 = vcombine.low %v5290_v35, %v5295_v36  ;;  %v62_v41 = vld [vmem:[%s6444_s0 + $0x5c] sm:$0xf]  ;;  %v5317_v42 = vld [vmem:[%s6444_s0 + $0x60] sm:$0xf]  ;;  %v5330_v45 = vld [vmem:[%s6444_s0 + $0x14] sm:$0xf] }
   0xd   :  { %v5320_v43 = vcombine.low %v62_v41, %v5317_v42  ;;  %v4827_v44 = vld [vmem:[%s6443_s1 + $0x34] ss:$8 sps:$4 sm:$0xff]   ;;  %v5335_v46 = vld [vmem:[%s6444_s0 + $0x18] sm:$0xf]  ;;  %v4832_v48 = vld [vmem:[%s6443_s1 + $0x44] ss:$8 sps:$4 sm:$0xff]   ;;  %v5392_v62 = vcombine.low %v5274_v31, %v62_v41 }
   0xe   :  { %v4825_v47 = vld [vmem:[%s6443_s1 + $0x30] ss:$8 sps:$4 sm:$0xff]   ;;  %v5349_v50 = vcombine.low %v5330_v45, %v5335_v46  ;;  %v4830_v51 = vld [vmem:[%s6443_s1 + $0x40] ss:$8 sps:$4 sm:$0xff]   ;;  %v64_v52 = vld [vmem:[%s6444_s0 + $0x64] sm:$0xf] }
   0xf   :  { %233 = vmatpush1.bf16.msra.mxu0 %v4795_v8  ;;  %577 = vmatpush1.bf16.msra.mxu1 %v4795_v8  ;;  %v65_v53 = vld [vmem:[%s6444_s0 + $0x68] sm:$0xf]  ;;  %v4837_v54 = vld [vmem:[%s6443_s1 + $0x54] ss:$8 sps:$4 sm:$0xff]   ;;  %v5375_v57 = vld [vmem:[%s6444_s0 + $0x20] sm:$0xf]  ;;  %v5427_v8 = vcombine.low %v5317_v42, %v64_v52 }
  0x10   :  { %234 = vmatprep.subr.bf16.mxu0 %v4796_v9  ;;  %578 = vmatprep.subr.bf16.mxu1 %v4796_v9  ;;  %v5363_v55 = vcombine.low %v64_v52, %v65_v53  ;;  %v5368_v56 = vld [vmem:[%s6444_s0 + $0x1c] sm:$0xf]  ;;  %v4835_v58 = vld [vmem:[%s6443_s1 + $0x50] ss:$8 sps:$4 sm:$0xff]   ;;  %v4842_v59 = vld [vmem:[%s6443_s1 + $0x64] ss:$8 sps:$4 sm:$0xff]  }
  0x11   :  { %v66_v60 = vld [vmem:[%s6444_s0 + $0x6c] sm:$0xf]  ;;  %v67_v61 = vld [vmem:[%s6444_s0 + $0x70] sm:$0xf]  ;;  %v5396_v63 = vcombine.low %v5368_v56, %v5375_v57  ;;  %v4840_v0 = vld [vmem:[%s6443_s1 + $0x60] ss:$8 sps:$4 sm:$0xff]   ;;  %v5544_v41 = vcombine.low %v5335_v46, %v5368_v56 }
  0x12   :  { %v5401_v2 = vcombine.low %v66_v60, %v67_v61  ;;  %v4847_v3 = vld [vmem:[%s6443_s1 + $0x74] ss:$8 sps:$4 sm:$0xff]   ;;  %v5413_v4 = vld [vmem:[%s6444_s0 + $0x24] sm:$0xf]  ;;  %v5418_v5 = vld [vmem:[%s6444_s0 + $0x28] sm:$0xf]  ;;  %v5447_v12 = vcombine.low %v65_v53, %v66_v60 }
  0x13   :  { %235 = vmatpush1.bf16.msra.mxu0 %v4798_v10  ;;  %579 = vmatpush1.bf16.msra.mxu1 %v4798_v10  ;;  %v4845_v6 = vld [vmem:[%s6443_s1 + $0x70] ss:$8 sps:$4 sm:$0xff]   ;;  %v4850_v7 = vld [vmem:[%s6443_s1 + $0x104] ss:$8 sps:$4 sm:$0xff]   ;;  %v5431_v9 = vcombine.low %v5413_v4, %v5418_v5  ;;  %v4848_v23 = vld [vmem:[%s6443_s1 + $0x100] ss:$8 sps:$4 sm:$0xff]  }
  0x14   :  { %236 = vmatprep.subr.bf16.mxu0 %v4799_v13  ;;  %580 = vmatprep.subr.bf16.mxu1 %v4799_v13  ;;  %v5440_v10 = vld [vmem:[%s6444_s0 + $0x2c] sm:$0xf]  ;;  %v5445_v11 = vld [vmem:[%s6444_s0 + $0x30] sm:$0xf]  ;;  %v4861_v31 = vld [vmem:[%s6443_s1 + $0x134] ss:$8 sps:$4 sm:$0xff]  }
  0x15   :  { %v5451_v13 = vcombine.low %v5440_v10, %v5445_v11  ;;  %v4859_v25 = vld [vmem:[%s6443_s1 + $0x130] ss:$8 sps:$4 sm:$0xff]   ;;  %v4863_v35 = vld [vmem:[%s6443_s1 + $0x140] ss:$8 sps:$4 sm:$0xff]   ;;  %v4880_v46 = vld [vmem:[%s6443_s1 + $0x184] ss:$8 sps:$4 sm:$0xff]  }
  0x16   :  { %v4871_v42 = vld [vmem:[%s6443_s1 + $0x160] ss:$8 sps:$4 sm:$0xff]   ;;  %v4883_v53 = vld [vmem:[%s6443_s1 + $0x194] ss:$8 sps:$4 sm:$0xff]   ;;  %v4887_v56 = vld [vmem:[%s6443_s1 + $0x1a4] ss:$8 sps:$4 sm:$0xff]  }
  0x17   :  { %237 = vmatpush1.bf16.msra.mxu0 %v4801_v15  ;;  %581 = vmatpush1.bf16.msra.mxu1 %v4801_v15  ;;  %v5460_v15 = vld [vmem:[%s6444_s0 + $0x74] sm:$0xf]  ;;  %v4878_v52 = vld [vmem:[%s6443_s1 + $0x180] ss:$8 sps:$4 sm:$0xff]  }
  0x18   :  { %238 = vmatprep.subr.bf16.mxu0 %v4802_v16  ;;  %582 = vmatprep.subr.bf16.mxu1 %v4802_v16  ;;  %v5465_v16 = vld [vmem:[%s6444_s0 + $0x34] sm:$0xf]  ;;  %v5473_v18 = vcombine.low %v67_v61, %v5460_v15  ;;  %v4897_v61 = vld [vmem:[%s6443_s1 + $0x1d0] ss:$8 sps:$4 sm:$0xff]  }
  0x19   :  { %v4899_v60 = vld [vmem:[%s6443_s1 + $0x1d4] ss:$8 sps:$4 sm:$0xff]  }
  0x1b   :  { %239 = vmatpush1.bf16.msra.mxu0 %v4804_v17  ;;  %583 = vmatpush1.bf16.msra.mxu1 %v4804_v17  ;;  %v5470_v17 = vld [vmem:[%s6444_s0 + $0x38] sm:$0xf] }
  0x1c   :  { %240 = vmatprep.subr.bf16.mxu0 %v4805_v20  ;;  %584 = vmatprep.subr.bf16.mxu1 %v4805_v20  ;;  %v5477_v19 = vcombine.low %v5465_v16, %v5470_v17  ;;  %v39_v20 = vld [vmem:[%s6444_s0] sm:$0xf] }
  0x1f   :  { %241 = vmatpush1.bf16.msra.mxu0 %v4807_v22  ;;  %585 = vmatpush1.bf16.msra.mxu1 %v4807_v22  ;;  %v3872_v22 = vcombine.low %v39_v20, %v5249_v24  ;;  %v4857_v24 = vld [vmem:[%s6443_s1 + $0x124] ss:$8 sps:$4 sm:$0xff]   ;;  %v4923_v20 = vld [vmem:[%s6443_s1 + $0x250] ss:$8 sps:$4 sm:$0xff]  }
  0x20   :  { %451 = vmatprep.subr.bf16.mxu0 %v4811_v26  ;;  %673 = vmatprep.subr.bf16.mxu1 %v4811_v26  ;;  %v4853_v26 = vld [vmem:[%s6443_s1 + $0x114] ss:$8 sps:$4 sm:$0xff]  }
  0x22   :  { %259 = vmatmul.mubr.bf16.vlgmr.msra.gmra.mrb[0].mxu0 %v5259_v27  ;;  %603 = vmatmul.mubr.bf16.vlgmr.msra.gmra.mrb[0].mxu1 %v5266_v29 }
  0x23   :  { %452 = vmatpush1.bf16.msra.mxu0 %v4809_v28  ;;  %674 = vmatpush1.bf16.msra.mxu1 %v4809_v28  ;;  %v4851_v28 = vld [vmem:[%s6443_s1 + $0x110] ss:$8 sps:$4 sm:$0xff]  }
  0x24   :  { %268 = vmatprep.mubr.bf16.mxu0 %v5114_v1  ;;  %453 = vmatprep.subr.bf16.mxu0 %v4816_v32 }
  0x25   :  { %612 = vmatprep.mubr.bf16.mxu1 %v5114_v1  ;;  %675 = vmatprep.subr.bf16.mxu1 %v4816_v32  ;;  %v4865_v32 = vld [vmem:[%s6443_s1 + $0x144] ss:$8 sps:$4 sm:$0xff]  }
  0x27   :  { %454 = vmatpush1.bf16.msra.mxu0 %v4814_v34  ;;  %676 = vmatpush1.bf16.msra.mxu1 %v4814_v34  ;;  %v5524_v34 = vcombine.low %v5295_v36, %v5330_v45  ;;  %v4867_v36 = vld [vmem:[%s6443_s1 + $0x150] ss:$8 sps:$4 sm:$0xff]  }
  0x28   :  { %455 = vmatprep.subr.bf16.mxu0 %v4822_v37  ;;  %677 = vmatprep.subr.bf16.mxu1 %v4822_v37  ;;  %v4869_v37 = vld [vmem:[%s6443_s1 + $0x154] ss:$8 sps:$4 sm:$0xff]   ;;  %v4875_v45 = vld [vmem:[%s6443_s1 + $0x170] ss:$8 sps:$4 sm:$0xff]  }
  0x2a   :  { %269 = vmatmul.mubr.bf16.gmra.mrb[4].mxu0 %v5302_v38  ;;  %613 = vmatmul.mubr.bf16.gmra.mrb[4].mxu1 %v5306_v39 }
  0x2b   :  { %278 = vmatprep.mubr.bf16.mxu0 %v5114_v1  ;;  %456 = vmatpush1.bf16.msra.mxu0 %v4820_v40 }
  0x2c   :  { %622 = vmatprep.mubr.bf16.mxu1 %v5114_v1  ;;  %678 = vmatpush1.bf16.msra.mxu1 %v4820_v40  ;;  %v4873_v40 = vld [vmem:[%s6443_s1 + $0x164] ss:$8 sps:$4 sm:$0xff]  }
  0x2d   :  { %457 = vmatprep.subr.bf16.mxu0 %v4827_v44  ;;  %679 = vmatprep.subr.bf16.mxu1 %v4827_v44  ;;  %v4877_v44 = vld [vmem:[%s6443_s1 + $0x174] ss:$8 sps:$4 sm:$0xff]  }
  0x2f   :  { %458 = vmatpush1.bf16.msra.mxu0 %v4825_v47 }
  0x30   :  { %680 = vmatpush1.bf16.msra.mxu1 %v4825_v47  ;;  %459 = vmatprep.subr.bf16.mxu0 %v4832_v48  ;;  %v5564_v47 = vcombine.low %v5375_v57, %v5413_v4  ;;  %v4891_v57 = vld [vmem:[%s6443_s1 + $0x1b4] ss:$8 sps:$4 sm:$0xff]   ;;  %v4905_v4 = vld [vmem:[%s6443_s1 + $0x1f0] ss:$8 sps:$4 sm:$0xff]  }
  0x31   :  { %681 = vmatprep.subr.bf16.mxu1 %v4832_v48  ;;  %v5572_v48 = vcombine.low %v5418_v5, %v5440_v10  ;;  %v4910_v5 = vld [vmem:[%s6443_s1 + $0x204] ss:$8 sps:$4 sm:$0xff]   ;;  %v4911_v10 = vld [vmem:[%s6443_s1 + $0x210] ss:$8 sps:$4 sm:$0xff]  }
  0x32   :  { %279 = vmatmul.mubr.bf16.gmra.mrb[8].mxu0 %v5345_v49  ;;  %623 = vmatmul.mubr.bf16.gmra.mrb[8].mxu1 %v5349_v50 }
  0x33   :  { %288 = vmatprep.mubr.bf16.mxu0 %v5114_v1  ;;  %632 = vmatprep.mubr.bf16.mxu1 %v5114_v1 }
  0x34   :  { %460 = vmatpush1.bf16.msra.mxu0 %v4830_v51  ;;  %682 = vmatpush1.bf16.msra.mxu1 %v4830_v51  ;;  %v5580_v51 = vcombine.low %v5445_v11, %v5465_v16  ;;  %v4916_v11 = vld [vmem:[%s6443_s1 + $0x224] ss:$8 sps:$4 sm:$0xff]  }
  0x35   :  { %461 = vmatprep.subr.bf16.mxu0 %v4837_v54  ;;  %683 = vmatprep.subr.bf16.mxu1 %v4837_v54  ;;  %v4881_v54 = vld [vmem:[%s6443_s1 + $0x190] ss:$8 sps:$4 sm:$0xff]   ;;  %v4922_v16 = vld [vmem:[%s6443_s1 + $0x244] ss:$8 sps:$4 sm:$0xff]  }
  0x38   :  { %462 = vmatpush1.bf16.msra.mxu0 %v4835_v58  ;;  %684 = vmatpush1.bf16.msra.mxu1 %v4835_v58  ;;  %v4889_v58 = vld [vmem:[%s6443_s1 + $0x1b0] ss:$8 sps:$4 sm:$0xff]  }
  0x39   :  { %463 = vmatprep.subr.bf16.mxu0 %v4842_v59  ;;  %685 = vmatprep.subr.bf16.mxu1 %v4842_v59  ;;  %v4895_v59 = vld [vmem:[%s6443_s1 + $0x1c4] ss:$8 sps:$4 sm:$0xff]  }
  0x3a   :  { %289 = vmatmul.mubr.bf16.gmra.mrb[12].mxu0 %v5392_v62  ;;  %633 = vmatmul.mubr.bf16.gmra.mrb[12].mxu1 %v5396_v63 }
  0x3b   :  { %298 = vmatprep.mubr.bf16.mxu0 %v5114_v1  ;;  %642 = vmatprep.mubr.bf16.mxu1 %v5114_v1 }
  0x3c   :  { %464 = vmatpush1.bf16.msra.mxu0 %v4840_v0  ;;  %686 = vmatpush1.bf16.msra.mxu1 %v4840_v0  ;;  %v4903_v0 = vld [vmem:[%s6443_s1 + $0x1e4] ss:$8 sps:$4 sm:$0xff]  }
  0x3d   :  { %465 = vmatprep.subr.bf16.mxu0 %v4847_v3  ;;  %687 = vmatprep.subr.bf16.mxu1 %v4847_v3  ;;  %v4907_v3 = vld [vmem:[%s6443_s1 + $0x1f4] ss:$8 sps:$4 sm:$0xff]  }
  0x40   :  { %466 = vmatpush1.bf16.msra.mxu0 %v4845_v6  ;;  %688 = vmatpush1.bf16.msra.mxu1 %v4845_v6 }
  0x41   :  { %873 = vmatprep.subr.bf16.mxu0 %v4850_v7  ;;  %1020 = vmatprep.subr.bf16.mxu1 %v4850_v7  ;;  %v4908_v7 = vld [vmem:[%s6443_s1 + $0x200] ss:$8 sps:$4 sm:$0xff]  }
  0x42   :  { %299 = vmatmul.mubr.bf16.gmra.mrb[16].mxu0 %v5427_v8  ;;  %643 = vmatmul.mubr.bf16.gmra.mrb[16].mxu1 %v5431_v9 }
  0x43   :  { %308 = vmatprep.mubr.bf16.mxu0 %v5114_v1  ;;  %652 = vmatprep.mubr.bf16.mxu1 %v5114_v1 }
  0x4a   :  { %309 = vmatmul.mubr.bf16.gmra.mrb[20].mxu0 %v5447_v12  ;;  %653 = vmatmul.mubr.bf16.gmra.mrb[20].mxu1 %v5451_v13 }
  0x4b   :  { %318 = vmatprep.mubr.bf16.mxu0 %v5114_v1  ;;  %662 = vmatprep.mubr.bf16.mxu1 %v5114_v1 }
  0x52   :  { %319 = vmatmul.mubr.bf16.gmra.mrb[24].mxu0 %v5473_v18  ;;  %663 = vmatmul.mubr.bf16.gmra.mrb[24].mxu1 %v5477_v19 }
  0x53   :  { %483 = vmatprep.mubr.bf16.mxu0 %v5114_v1  ;;  %705 = vmatprep.mubr.bf16.mxu1 %v5114_v1 }
  0x5a   :  { %484 = vmatmul.mubr.bf16.vlgmr.msra.gmra.mrb[0].mxu0 %v3872_v22  ;;  %706 = vmatmul.mubr.bf16.vlgmr.msra.gmra.mrb[0].mxu1 %v5259_v27  ;;  %v4855_v27 = vld [vmem:[%s6443_s1 + $0x120] ss:$8 sps:$4 sm:$0xff]   ;;  %v4928_v22 = vld [vmem:[%s6443_s1 + $0x264] ss:$8 sps:$4 sm:$0xff]  }
  0x5b   :  { %874 = vmatpush1.bf16.msra.mxu0 %v4848_v23  ;;  %1021 = vmatpush1.bf16.msra.mxu1 %v4848_v23  ;;  %v4932_v23 = vld [vmem:[%s6443_s1 + $0x274] ss:$8 sps:$4 sm:$0xff]  }
  0x5c   :  { %493 = vmatprep.mubr.bf16.mxu0 %v5114_v1  ;;  %715 = vmatprep.mubr.bf16.mxu1 %v5114_v1 }
  0x5d   :  { %875 = vmatprep.subr.bf16.mxu0 %v4853_v26  ;;  %1022 = vmatprep.subr.bf16.mxu1 %v4853_v26  ;;  %v4930_v26 = vld [vmem:[%s6443_s1 + $0x270] ss:$8 sps:$4 sm:$0xff]  }
  0x5f   :  { %876 = vmatpush1.bf16.msra.mxu0 %v4851_v28  ;;  %1023 = vmatpush1.bf16.msra.mxu1 %v4851_v28  ;;  %v4936_v28 = vld [vmem:[%s6445_s3 + $0x84] ss:$8 sps:$4 sm:$0xff]  }
  0x60   :  { %877 = vmatprep.subr.bf16.mxu0 %v4857_v24  ;;  %1024 = vmatprep.subr.bf16.mxu1 %v4857_v24  ;;  %v4939_v24 = vld [vmem:[%s6445_s3 + $0x94] ss:$8 sps:$4 sm:$0xff]  }
  0x62   :  { %494 = vmatmul.mubr.bf16.gmra.mrb[4].mxu0 %v5504_v30  ;;  %716 = vmatmul.mubr.bf16.gmra.mrb[4].mxu1 %v5302_v38 }
  0x63   :  { %503 = vmatprep.mubr.bf16.mxu0 %v5114_v1  ;;  %725 = vmatprep.mubr.bf16.mxu1 %v5114_v1 }
  0x64   :  { %878 = vmatpush1.bf16.msra.mxu0 %v4855_v27  ;;  %1025 = vmatpush1.bf16.msra.mxu1 %v4855_v27  ;;  %v4942_v27 = vld [vmem:[%s6445_s3 + $0xa4] ss:$8 sps:$4 sm:$0xff]  }
  0x65   :  { %879 = vmatprep.subr.bf16.mxu0 %v4861_v31  ;;  %1026 = vmatprep.subr.bf16.mxu1 %v4861_v31  ;;  %v4943_v31 = vld [vmem:[%s6445_s3 + $0xb0] ss:$8 sps:$4 sm:$0xff]  }
  0x68   :  { %880 = vmatpush1.bf16.msra.mxu0 %v4859_v25  ;;  %1027 = vmatpush1.bf16.msra.mxu1 %v4859_v25  ;;  %v4948_v25 = vld [vmem:[%s6445_s3 + $0xc4] ss:$8 sps:$4 sm:$0xff]  }
  0x69   :  { %881 = vmatprep.subr.bf16.mxu0 %v4865_v32  ;;  %1028 = vmatprep.subr.bf16.mxu1 %v4865_v32  ;;  %v4946_v32 = vld [vmem:[%s6445_s3 + $0xc0] ss:$8 sps:$4 sm:$0xff]  }
  0x6a   :  { %504 = vmatmul.mubr.bf16.gmra.mrb[8].mxu0 %v5524_v34  ;;  %726 = vmatmul.mubr.bf16.gmra.mrb[8].mxu1 %v5345_v49 }
  0x6b   :  { %513 = vmatprep.mubr.bf16.mxu0 %v5114_v1  ;;  %735 = vmatprep.mubr.bf16.mxu1 %v5114_v1 }
  0x6c   :  { %882 = vmatpush1.bf16.msra.mxu0 %v4863_v35  ;;  %1029 = vmatpush1.bf16.msra.mxu1 %v4863_v35  ;;  %v4957_v35 = vld [vmem:[%s6445_s3 + $0xf4] ss:$8 sps:$4 sm:$0xff]  }
  0x6d   :  { %883 = vmatprep.subr.bf16.mxu0 %v4869_v37  ;;  %1030 = vmatprep.subr.bf16.mxu1 %v4869_v37  ;;  %v4955_v37 = vld [vmem:[%s6445_s3 + $0xf0] ss:$8 sps:$4 sm:$0xff]  }
  0x70   :  { %884 = vmatpush1.bf16.msra.mxu0 %v4867_v36  ;;  %1031 = vmatpush1.bf16.msra.mxu1 %v4867_v36  ;;  %v4960_v36 = vld [vmem:[%s6445_s3 + $0x4] ss:$8 sps:$4 sm:$0xff]  }
  0x71   :  { %885 = vmatprep.subr.bf16.mxu0 %v4873_v40  ;;  %1032 = vmatprep.subr.bf16.mxu1 %v4873_v40  ;;  %v1907_v40 = vlaneseq }
  0x72   :  { %514 = vmatmul.mubr.bf16.gmra.mrb[12].mxu0 %v5544_v41  ;;  %736 = vmatmul.mubr.bf16.gmra.mrb[12].mxu1 %v5392_v62 }
  0x73   :  { %523 = vmatprep.mubr.bf16.mxu0 %v5114_v1  ;;  %745 = vmatprep.mubr.bf16.mxu1 %v5114_v1 }
  0x74   :  { %886 = vmatpush1.bf16.msra.mxu0 %v4871_v42  ;;  %1033 = vmatpush1.bf16.msra.mxu1 %v4871_v42 }
  0x75   :  { %887 = vmatprep.subr.bf16.mxu0 %v4877_v44  ;;  %1034 = vmatprep.subr.bf16.mxu1 %v4877_v44  ;;  %v1905_v44 = vld [vmem:[%s6446_s2] sm:$0x3] }
  0x78   :  { %888 = vmatpush1.bf16.msra.mxu0 %v4875_v45  ;;  %1035 = vmatpush1.bf16.msra.mxu1 %v4875_v45 }
  0x79   :  { %1248 = vmatprep.subr.bf16.mxu0 %v4880_v46  ;;  %1383 = vmatprep.subr.bf16.mxu1 %v4880_v46 }
  0x7a   :  { %524 = vmatmul.mubr.bf16.gmra.mrb[16].mxu0 %v5564_v47  ;;  %746 = vmatmul.mubr.bf16.gmra.mrb[16].mxu1 %v5427_v8 }
  0x7b   :  { %533 = vmatprep.mubr.bf16.mxu0 %v5114_v1  ;;  %755 = vmatprep.mubr.bf16.mxu1 %v5114_v1 }
  0x82   :  { %534 = vmatmul.mubr.bf16.gmra.mrb[20].mxu0 %v5572_v48  ;;  %756 = vmatmul.mubr.bf16.gmra.mrb[20].mxu1 %v5447_v12 }
  0x83   :  { %543 = vmatprep.mubr.bf16.mxu0 %v5114_v1  ;;  %765 = vmatprep.mubr.bf16.mxu1 %v5114_v1 }
  0x8a   :  { %544 = vmatmul.mubr.bf16.gmra.mrb[24].mxu0 %v5580_v51  ;;  %766 = vmatmul.mubr.bf16.gmra.mrb[24].mxu1 %v5473_v18 }
  0x8b   :  { %905 = vmatprep.mubr.bf16.mxu0 %v5114_v1  ;;  %1052 = vmatprep.mubr.bf16.mxu1 %v5114_v1 }
  0x92   :  { %906 = vmatmul.mubr.bf16.vlgmr.msra.gmra.mrb[0].mxu0 %v5266_v29  ;;  %1053 = vmatmul.mubr.bf16.vlgmr.msra.gmra.mrb[0].mxu1 %v5218_v14  ;;  %v4885_v29 = vld [vmem:[%s6443_s1 + $0x1a0] ss:$8 sps:$4 sm:$0xff]  }
  0x93   :  { %1249 = vmatpush1.bf16.msra.mxu0 %v4878_v52  ;;  %1384 = vmatpush1.bf16.msra.mxu1 %v4878_v52 }
  0x94   :  { %915 = vmatprep.mubr.bf16.mxu0 %v5114_v1  ;;  %1062 = vmatprep.mubr.bf16.mxu1 %v5114_v1 }
  0x95   :  { %1250 = vmatprep.subr.bf16.mxu0 %v4883_v53  ;;  %1385 = vmatprep.subr.bf16.mxu1 %v4883_v53 }
  0x97   :  { %1251 = vmatpush1.bf16.msra.mxu0 %v4881_v54  ;;  %1386 = vmatpush1.bf16.msra.mxu1 %v4881_v54 }
  0x98   :  { %1252 = vmatprep.subr.bf16.mxu0 %v4887_v56  ;;  %1387 = vmatprep.subr.bf16.mxu1 %v4887_v56 }
  0x9a   :  { %916 = vmatmul.mubr.bf16.gmra.mrb[4].mxu0 %v5306_v39  ;;  %1063 = vmatmul.mubr.bf16.gmra.mrb[4].mxu1 %v5238_v21  ;;  %v4893_v39 = vld [vmem:[%s6443_s1 + $0x1c0] ss:$8 sps:$4 sm:$0xff]  }
  0x9b   :  { %925 = vmatprep.mubr.bf16.mxu0 %v5114_v1  ;;  %1072 = vmatprep.mubr.bf16.mxu1 %v5114_v1 }
  0x9c   :  { %1253 = vmatpush1.bf16.msra.mxu0 %v4885_v29  ;;  %1388 = vmatpush1.bf16.msra.mxu1 %v4885_v29 }
  0x9d   :  { %1254 = vmatprep.subr.bf16.mxu0 %v4891_v57  ;;  %1389 = vmatprep.subr.bf16.mxu1 %v4891_v57 }
  0xa0   :  { %1255 = vmatpush1.bf16.msra.mxu0 %v4889_v58  ;;  %1390 = vmatpush1.bf16.msra.mxu1 %v4889_v58 }
  0xa1   :  { %1256 = vmatprep.subr.bf16.mxu0 %v4895_v59  ;;  %1391 = vmatprep.subr.bf16.mxu1 %v4895_v59 }
  0xa2   :  { %926 = vmatmul.mubr.bf16.gmra.mrb[8].mxu0 %v5349_v50  ;;  %1073 = vmatmul.mubr.bf16.gmra.mrb[8].mxu1 %v5280_v33  ;;  %v4901_v50 = vld [vmem:[%s6443_s1 + $0x1e0] ss:$8 sps:$4 sm:$0xff]  }
  0xa3   :  { %935 = vmatprep.mubr.bf16.mxu0 %v5114_v1  ;;  %1082 = vmatprep.mubr.bf16.mxu1 %v5114_v1 }
  0xa4   :  { %1257 = vmatpush1.bf16.msra.mxu0 %v4893_v39  ;;  %1392 = vmatpush1.bf16.msra.mxu1 %v4893_v39 }
  0xa5   :  { %1258 = vmatprep.subr.bf16.mxu0 %v4899_v60  ;;  %1393 = vmatprep.subr.bf16.mxu1 %v4899_v60 }
  0xa8   :  { %1259 = vmatpush1.bf16.msra.mxu0 %v4897_v61  ;;  %1394 = vmatpush1.bf16.msra.mxu1 %v4897_v61 }
  0xa9   :  { %1260 = vmatprep.subr.bf16.mxu0 %v4903_v0  ;;  %1395 = vmatprep.subr.bf16.mxu1 %v4903_v0 }
  0xaa   :  { %936 = vmatmul.mubr.bf16.gmra.mrb[12].mxu0 %v5396_v63  ;;  %1083 = vmatmul.mubr.bf16.gmra.mrb[12].mxu1 %v5320_v43  ;;  %v5657_v63 = vld [vmem:[%s6444_s0 + $0x78] sm:$0xf] }
  0xab   :  { %945 = vmatprep.mubr.bf16.mxu0 %v5114_v1  ;;  %1092 = vmatprep.mubr.bf16.mxu1 %v5114_v1  ;;  %v5665_v6 = vcombine.low %v5460_v15, %v5657_v63  ;;  %v4917_v15 = vld [vmem:[%s6443_s1 + $0x230] ss:$8 sps:$4 sm:$0xff]  }
  0xac   :  { %1261 = vmatpush1.bf16.msra.mxu0 %v4901_v50  ;;  %1396 = vmatpush1.bf16.msra.mxu1 %v4901_v50 }
  0xad   :  { %1262 = vmatprep.subr.bf16.mxu0 %v4907_v3  ;;  %1397 = vmatprep.subr.bf16.mxu1 %v4907_v3 }
  0xb0   :  { %1263 = vmatpush1.bf16.msra.mxu0 %v4905_v4  ;;  %1398 = vmatpush1.bf16.msra.mxu1 %v4905_v4 }
  0xb1   :  { %1611 = vmatprep.subr.bf16.mxu0 %v4910_v5  ;;  %1746 = vmatprep.subr.bf16.mxu1 %v4910_v5 }
  0xb2   :  { %946 = vmatmul.mubr.bf16.gmra.mrb[16].mxu0 %v5431_v9  ;;  %1093 = vmatmul.mubr.bf16.gmra.mrb[16].mxu1 %v5363_v55  ;;  %v4913_v9 = vld [vmem:[%s6443_s1 + $0x214] ss:$8 sps:$4 sm:$0xff]  }
  0xb3   :  { %955 = vmatprep.mubr.bf16.mxu0 %v5114_v1  ;;  %1102 = vmatprep.mubr.bf16.mxu1 %v5114_v1 }
  0xba   :  { %956 = vmatmul.mubr.bf16.gmra.mrb[20].mxu0 %v5451_v13  ;;  %1103 = vmatmul.mubr.bf16.gmra.mrb[20].mxu1 %v5401_v2  ;;  %v4914_v13 = vld [vmem:[%s6443_s1 + $0x220] ss:$8 sps:$4 sm:$0xff]  }
  0xbb   :  { %965 = vmatprep.mubr.bf16.mxu0 %v5114_v1  ;;  %1112 = vmatprep.mubr.bf16.mxu1 %v5114_v1 }
  0xc2   :  { %966 = vmatmul.mubr.bf16.gmra.mrb[24].mxu0 %v5477_v19  ;;  %1113 = vmatmul.mubr.bf16.gmra.mrb[24].mxu1 %v5665_v6  ;;  %v4925_v19 = vld [vmem:[%s6443_s1 + $0x254] ss:$8 sps:$4 sm:$0xff]  }
  0xc3   :  { %1280 = vmatprep.mubr.bf16.mxu0 %v5114_v1  ;;  %1415 = vmatprep.mubr.bf16.mxu1 %v5114_v1 }
  0xca   :  { %1281 = vmatmul.mubr.bf16.vlgmr.msra.gmra.mrb[0].mxu0 %v5218_v14  ;;  %1416 = vmatmul.mubr.bf16.vlgmr.msra.gmra.mrb[0].mxu1 %v5504_v30  ;;  %v4919_v14 = vld [vmem:[%s6443_s1 + $0x234] ss:$8 sps:$4 sm:$0xff]  }
  0xcb   :  { %1612 = vmatpush1.bf16.msra.mxu0 %v4908_v7  ;;  %1747 = vmatpush1.bf16.msra.mxu1 %v4908_v7 }
  0xcc   :  { %1290 = vmatprep.mubr.bf16.mxu0 %v5114_v1  ;;  %1425 = vmatprep.mubr.bf16.mxu1 %v5114_v1 }
  0xcd   :  { %1613 = vmatprep.subr.bf16.mxu0 %v4913_v9  ;;  %1748 = vmatprep.subr.bf16.mxu1 %v4913_v9 }
  0xcf   :  { %1614 = vmatpush1.bf16.msra.mxu0 %v4911_v10  ;;  %1749 = vmatpush1.bf16.msra.mxu1 %v4911_v10 }
  0xd0   :  { %1615 = vmatprep.subr.bf16.mxu0 %v4916_v11  ;;  %1750 = vmatprep.subr.bf16.mxu1 %v4916_v11 }
  0xd2   :  { %1291 = vmatmul.mubr.bf16.gmra.mrb[4].mxu0 %v5238_v21  ;;  %1426 = vmatmul.mubr.bf16.gmra.mrb[4].mxu1 %v5524_v34  ;;  %v4920_v21 = vld [vmem:[%s6443_s1 + $0x240] ss:$8 sps:$4 sm:$0xff]  }
  0xd3   :  { %1300 = vmatprep.mubr.bf16.mxu0 %v5114_v1  ;;  %1435 = vmatprep.mubr.bf16.mxu1 %v5114_v1 }
  0xd4   :  { %1616 = vmatpush1.bf16.msra.mxu0 %v4914_v13  ;;  %1751 = vmatpush1.bf16.msra.mxu1 %v4914_v13 }
  0xd5   :  { %1617 = vmatprep.subr.bf16.mxu0 %v4919_v14  ;;  %1752 = vmatprep.subr.bf16.mxu1 %v4919_v14 }
  0xd8   :  { %1618 = vmatpush1.bf16.msra.mxu0 %v4917_v15  ;;  %1753 = vmatpush1.bf16.msra.mxu1 %v4917_v15 }
  0xd9   :  { %1619 = vmatprep.subr.bf16.mxu0 %v4922_v16  ;;  %1754 = vmatprep.subr.bf16.mxu1 %v4922_v16 }
  0xda   :  { %1301 = vmatmul.mubr.bf16.gmra.mrb[8].mxu0 %v5280_v33  ;;  %1436 = vmatmul.mubr.bf16.gmra.mrb[8].mxu1 %v5544_v41  ;;  %v4926_v33 = vld [vmem:[%s6443_s1 + $0x260] ss:$8 sps:$4 sm:$0xff]  }
  0xdb   :  { %1310 = vmatprep.mubr.bf16.mxu0 %v5114_v1  ;;  %1445 = vmatprep.mubr.bf16.mxu1 %v5114_v1 }
  0xdc   :  { %1620 = vmatpush1.bf16.msra.mxu0 %v4920_v21  ;;  %1755 = vmatpush1.bf16.msra.mxu1 %v4920_v21 }
  0xdd   :  { %1621 = vmatprep.subr.bf16.mxu0 %v4925_v19  ;;  %1756 = vmatprep.subr.bf16.mxu1 %v4925_v19 }
  0xe0   :  { %1622 = vmatpush1.bf16.msra.mxu0 %v4923_v20  ;;  %1757 = vmatpush1.bf16.msra.mxu1 %v4923_v20 }
  0xe1   :  { %1623 = vmatprep.subr.bf16.mxu0 %v4928_v22  ;;  %1758 = vmatprep.subr.bf16.mxu1 %v4928_v22 }
  0xe2   :  { %1311 = vmatmul.mubr.bf16.gmra.mrb[12].mxu0 %v5320_v43  ;;  %1446 = vmatmul.mubr.bf16.gmra.mrb[12].mxu1 %v5564_v47  ;;  %v54_v43 = vld [vmem:[%s6444_s0 + $0x3c] sm:$0xf] }
  0xe3   :  { %1320 = vmatprep.mubr.bf16.mxu0 %v5114_v1  ;;  %1455 = vmatprep.mubr.bf16.mxu1 %v5114_v1 }
  0xe4   :  { %1624 = vmatpush1.bf16.msra.mxu0 %v4926_v33  ;;  %1759 = vmatpush1.bf16.msra.mxu1 %v4926_v33 }
  0xe5   :  { %1625 = vmatprep.subr.bf16.mxu0 %v4932_v23  ;;  %1760 = vmatprep.subr.bf16.mxu1 %v4932_v23 }
  0xe8   :  { %1626 = vmatpush1.bf16.msra.mxu0 %v4930_v26  ;;  %1761 = vmatpush1.bf16.msra.mxu1 %v4930_v26 }
  0xe9   :  { %2130 = vmatprep.subr.bf16.mxu0 %v4936_v28 }
  0xea   :  { %1321 = vmatmul.mubr.bf16.gmra.mrb[16].mxu0 %v5363_v55  ;;  %1456 = vmatmul.mubr.bf16.gmra.mrb[16].mxu1 %v5572_v48  ;;  %v3973_v55 = vcombine.low %v5470_v17, %v54_v43  ;;  %v4937_v17 = vld [vmem:[%s6445_s3 + $0x90] ss:$8 sps:$4 sm:$0xff]  }
  0xeb   :  { %1330 = vmatprep.mubr.bf16.mxu0 %v5114_v1  ;;  %1465 = vmatprep.mubr.bf16.mxu1 %v5114_v1 }
  0xf2   :  { %1331 = vmatmul.mubr.bf16.gmra.mrb[20].mxu0 %v5401_v2  ;;  %1466 = vmatmul.mubr.bf16.gmra.mrb[20].mxu1 %v5580_v51  ;;  %v4934_v2 = vld [vmem:[%s6445_s3 + $0x80] ss:$8 sps:$4 sm:$0xff]  }
  0xf3   :  { %1340 = vmatprep.mubr.bf16.mxu0 %v5114_v1  ;;  %1475 = vmatprep.mubr.bf16.mxu1 %v5114_v1 }
  0xfa   :  { %1341 = vmatmul.mubr.bf16.gmra.mrb[24].mxu0 %v5665_v6  ;;  %1476 = vmatmul.mubr.bf16.gmra.mrb[24].mxu1 %v3973_v55 }
  0xfb   :  { %1643 = vmatprep.mubr.bf16.mxu0 %v5114_v1  ;;  %1778 = vmatprep.mubr.bf16.mxu1 %v5114_v1 }
 0x102   :  { %1644 = vmatmul.mubr.bf16.vlgmr.msra.gmra.mrb[0].mxu0 %v5504_v30  ;;  %1779 = vmatmul.mubr.bf16.vlgmr.msra.gmra.mrb[0].mxu1 %v5302_v38  ;;  %v4940_v30 = vld [vmem:[%s6445_s3 + $0xa0] ss:$8 sps:$4 sm:$0xff]   ;;  %v4945_v38 = vld [vmem:[%s6445_s3 + $0xb4] ss:$8 sps:$4 sm:$0xff]  }
 0x103   :  { %1653 = vmatprep.mubr.bf16.mxu0 %v5114_v1  ;;  %1788 = vmatprep.mubr.bf16.mxu1 %v5114_v1 }
 0x104   :  { %2131 = vmatpush1.bf16.msra.mxu0 %v4934_v2 }
 0x105   :  { %2132 = vmatprep.subr.bf16.mxu0 %v4939_v24 }
 0x108   :  { %2133 = vmatpush1.bf16.msra.mxu0 %v4937_v17 }
 0x109   :  { %2134 = vmatprep.subr.bf16.mxu0 %v4942_v27 }
 0x10a   :  { %1654 = vmatmul.mubr.bf16.gmra.mrb[4].mxu0 %v5524_v34  ;;  %1789 = vmatmul.mubr.bf16.gmra.mrb[4].mxu1 %v5345_v49  ;;  %v70_v49 = vld [vmem:[%s6444_s0 + $0x7c] sm:$0xf]  ;;  %v4952_v34 = vld [vmem:[%s6445_s3 + $0xe0] ss:$8 sps:$4 sm:$0xff]  }
 0x10b   :  { %1663 = vmatprep.mubr.bf16.mxu0 %v5114_v1  ;;  %1798 = vmatprep.mubr.bf16.mxu1 %v5114_v1 }
 0x10c   :  { %2135 = vmatpush1.bf16.msra.mxu0 %v4940_v30 }
 0x10d   :  { %2136 = vmatprep.subr.bf16.mxu0 %v4945_v38 }
 0x110   :  { %2137 = vmatpush1.bf16.msra.mxu0 %v4943_v31 }
 0x111   :  { %2138 = vmatprep.subr.bf16.mxu0 %v4948_v25 }
 0x112   :  { %1664 = vmatmul.mubr.bf16.gmra.mrb[8].mxu0 %v5544_v41  ;;  %1799 = vmatmul.mubr.bf16.gmra.mrb[8].mxu1 %v5392_v62  ;;  %v4006_v62 = vcombine.low %v5657_v63, %v70_v49  ;;  %v5828_v41 = vshrl.u32 %v1907_v40, 7 }
 0x113   :  { %1673 = vmatprep.mubr.bf16.mxu0 %v5114_v1  ;;  %1808 = vmatprep.mubr.bf16.mxu1 %v5114_v1 }
 0x114   :  { %2139 = vmatpush1.bf16.msra.mxu0 %v4946_v32  ;;  %v1909_v42 = vsub.s32 0, %v5828_v41  ;;  %v1913_v45 = vsub.s32 1, %v5828_v41 }
 0x116   :  { %v5837_v46 = vrot.slane %v1905_v44, %v1909_v42 }
 0x11a   :  { %1674 = vmatmul.mubr.bf16.gmra.mrb[12].mxu0 %v5564_v47  ;;  %1809 = vmatmul.mubr.bf16.gmra.mrb[12].mxu1 %v5427_v8  ;;  %v4951_v8 = vld [vmem:[%s6445_s3 + $0xd4] ss:$8 sps:$4 sm:$0xff]  }
 0x11b   :  { %1683 = vmatprep.mubr.bf16.mxu0 %v5114_v1  ;;  %1818 = vmatprep.mubr.bf16.mxu1 %v5114_v1 }
 0x11c   :  { %2140 = vmatprep.subr.bf16.mxu0 %v4951_v8 }
 0x122   :  { %1684 = vmatmul.mubr.bf16.gmra.mrb[16].mxu0 %v5572_v48  ;;  %1819 = vmatmul.mubr.bf16.gmra.mrb[16].mxu1 %v5447_v12  ;;  %v4949_v12 = vld [vmem:[%s6445_s3 + $0xd0] ss:$8 sps:$4 sm:$0xff]  }
 0x123   :  { %1693 = vmatprep.mubr.bf16.mxu0 %v5114_v1  ;;  %1828 = vmatprep.mubr.bf16.mxu1 %v5114_v1 }
 0x124   :  { %2141 = vmatpush1.bf16.msra.mxu0 %v4949_v12 }
 0x12a   :  { %1694 = vmatmul.mubr.bf16.gmra.mrb[20].mxu0 %v5580_v51  ;;  %1829 = vmatmul.mubr.bf16.gmra.mrb[20].mxu1 %v5473_v18  ;;  %v4954_v18 = vld [vmem:[%s6445_s3 + $0xe4] ss:$8 sps:$4 sm:$0xff]   ;;  %v5841_v51 = vrot.slane %v1905_v44, %v1913_v45 }
 0x12b   :  { %1703 = vmatprep.mubr.bf16.mxu0 %v5114_v1  ;;  %1838 = vmatprep.mubr.bf16.mxu1 %v5114_v1 }
 0x12c   :  { %2142 = vmatprep.subr.bf16.mxu0 %v4954_v18 }
 0x12d   :  { %2143 = vmatpush1.bf16.msra.mxu0 %v4952_v34 }
 0x12e   :  { %2144 = vmatprep.subr.bf16.mxu0 %v4957_v35 }
 0x131   :  { %2145 = vmatpush1.bf16.msra.mxu0 %v4955_v37 }
 0x132   :  { %1704 = vmatmul.mubr.bf16.gmra.mrb[24].mxu0 %v3973_v55  ;;  %1839 = vmatmul.mubr.bf16.gmra.mrb[24].mxu1 %v4006_v62 }
 0x133   :  { %2162 = vmatprep.mubr.bf16.mxu0 %v5114_v1  ;;  %2293 = vmatprep.subr.bf16.mxu0 %v4960_v36 }
 0x1d5   :  { %v1645_v47 = vpop.f32.mrb[0].mxu0  ;;  %v1780_v48 = vpop.f32.mrb[0].mxu1 }
 0x1d6   :  { %v1877_v52 = vmax.f32 %v1645_v47, %v1780_v48  ;;  %v1647_v53 = vpop.f32.mrb[1].mxu0  ;;  %v1782_v54 = vpop.f32.mrb[1].mxu1 }
 0x1d7   :  { %v1878_v56 = vmax.f32 %v1647_v53, %v1782_v54  ;;  %v1649_v29 = vpop.f32.mrb[2].mxu0  ;;  %v1784_v57 = vpop.f32.mrb[2].mxu1 }
 0x1d8   :  { %v1917_v58 = vadd.f32 %v5837_v46, %v1877_v52  ;;  %v1879_v59 = vmax.f32 %v1649_v29, %v1784_v57  ;;  %v1651_v39 = vpop.f32.mrb[3].mxu0  ;;  %v1786_v60 = vpop.f32.mrb[3].mxu1 }
 0x1d9   :  { %v1918_v61 = vadd.f32 %v5841_v51, %v1878_v56  ;;  %v1880_v0 = vmax.f32 %v1651_v39, %v1786_v60  ;;  %v4963_v60 = vld [vmem:[%s6445_s3 + $0x14] ss:$8 sps:$4 sm:$0xff]  }
 0x1da   :  { %v1945_v50 = vmax.f32 %v1917_v58, 0.0  ;;  %v1919_v3 = vadd.f32 %v5837_v46, %v1879_v59  ;;  %v4958_v59 = vld [vmem:[%s6445_s3] ss:$8 sps:$4 sm:$0xff]  }
 0x1db   :  { %v1946_v4 = vmax.f32 %v1918_v61, 0.0  ;;  %v1920_v5 = vadd.f32 %v5841_v51, %v1880_v0 }
 0x1dc   :  { %v1947_v63 = vmax.f32 %v1919_v3, 0.0 }
 0x1dd   :  { %v1973_v6 = vmax.f32 %v1945_v50, %v1946_v4  ;;  %v1948_v7 = vmax.f32 %v1920_v5, 0.0  ;;  %v1655_v9 = vpop.f32.mrb[4].mxu0  ;;  %v1790_v10 = vpop.f32.mrb[4].mxu1 }
 0x1de   :  { %v1881_v11 = vmax.f32 %v1655_v9, %v1790_v10  ;;  %v1657_v13 = vpop.f32.mrb[5].mxu0  ;;  %v1792_v14 = vpop.f32.mrb[5].mxu1 }
 0x1df   :  { %v1974_v15 = vmax.f32 %v1947_v63, %v1948_v7  ;;  %v1882_v16 = vmax.f32 %v1657_v13, %v1792_v14  ;;  %v1659_v21 = vpop.f32.mrb[6].mxu0  ;;  %v1794_v19 = vpop.f32.mrb[6].mxu1  ;;  %v4961_v13 = vld [vmem:[%s6445_s3 + $0x10] ss:$8 sps:$4 sm:$0xff]  }
 0x1e0   :  { %v1921_v20 = vadd.f32 %v5837_v46, %v1881_v11  ;;  %v1883_v22 = vmax.f32 %v1659_v21, %v1794_v19  ;;  %v1661_v33 = vpop.f32.mrb[7].mxu0  ;;  %v1796_v23 = vpop.f32.mrb[7].mxu1  ;;  %v4966_v19 = vld [vmem:[%s6445_s3 + $0x24] ss:$8 sps:$4 sm:$0xff]  }
 0x1e1   :  { %v5848_v26 = vpack.c.bf16 %v1974_v15, %v1973_v6  ;;  %v1922_v28 = vadd.f32 %v5841_v51, %v1882_v16  ;;  %v1884_v43 = vmax.f32 %v1661_v33, %v1796_v23 }
 0x1e2   :  { %v1949_v55 = vmax.f32 %v1921_v20, 0.0  ;;  %v1923_v2 = vadd.f32 %v5837_v46, %v1883_v22 }
 0x1e3   :  { %v1950_v24 = vmax.f32 %v1922_v28, 0.0  ;;  %v1924_v17 = vadd.f32 %v5841_v51, %v1884_v43  ;;  %v2034_v56 = vrot.slane %v5848_v26, 4 }
 0x1e4   :  { %v1951_v27 = vmax.f32 %v1923_v2, 0.0 }
 0x1e5   :  { %v1975_v30 = vmax.f32 %v1949_v55, %v1950_v24  ;;  %v1952_v38 = vmax.f32 %v1924_v17, 0.0  ;;  %v1665_v31 = vpop.f32.mrb[8].mxu0  ;;  %v1800_v25 = vpop.f32.mrb[8].mxu1  ;;  %v4964_v24 = vld [vmem:[%s6445_s3 + $0x20] ss:$8 sps:$4 sm:$0xff]  }
 0x1e6   :  { %v1885_v32 = vmax.f32 %v1665_v31, %v1800_v25  ;;  %v1667_v49 = vpop.f32.mrb[9].mxu0  ;;  %v1802_v62 = vpop.f32.mrb[9].mxu1 }
 0x1e7   :  { %v1976_v8 = vmax.f32 %v1951_v27, %v1952_v38  ;;  %v1886_v12 = vmax.f32 %v1667_v49, %v1802_v62  ;;  %v1669_v18 = vpop.f32.mrb[10].mxu0  ;;  %v1804_v34 = vpop.f32.mrb[10].mxu1  ;;  %v4969_v27 = vld [vmem:[%s6445_s3 + $0x34] ss:$8 sps:$4 sm:$0xff]  }
 0x1e8   :  { %v1925_v35 = vadd.f32 %v5837_v46, %v1885_v32  ;;  %v1887_v37 = vmax.f32 %v1669_v18, %v1804_v34  ;;  %v1671_v36 = vpop.f32.mrb[11].mxu0  ;;  %v1806_v44 = vpop.f32.mrb[11].mxu1 }
 0x1e9   :  { %v5854_v47 = vpack.c.bf16 %v1976_v8, %v1975_v30  ;;  %v1926_v48 = vadd.f32 %v5841_v51, %v1886_v12  ;;  %v1888_v52 = vmax.f32 %v1671_v36, %v1806_v44 }
 0x1ea   :  { %v1953_v53 = vmax.f32 %v1925_v35, 0.0  ;;  %v1927_v54 = vadd.f32 %v5837_v46, %v1887_v37  ;;  %v4967_v37 = vld [vmem:[%s6445_s3 + $0x30] ss:$8 sps:$4 sm:$0xff]  }
 0x1eb   :  { %v1954_v29 = vmax.f32 %v1926_v48, 0.0  ;;  %v1928_v57 = vadd.f32 %v5841_v51, %v1888_v52  ;;  %v2035_v58 = vrot.slane %v5854_v47, 4 }
 0x1ec   :  { %v1955_v39 = vmax.f32 %v1927_v54, 0.0 }
 0x1ed   :  { %v1977_v61 = vmax.f32 %v1953_v53, %v1954_v29  ;;  %v1956_v0 = vmax.f32 %v1928_v57, 0.0  ;;  %v1675_v50 = vpop.f32.mrb[12].mxu0  ;;  %v1810_v3 = vpop.f32.mrb[12].mxu1  ;;  %v2036_v4 = vsel %vm2033_vm0, %v2034_v56, %v2035_v58  ;;  %v4972_v53 = vld [vmem:[%s6445_s3 + $0x44] ss:$8 sps:$4 sm:$0xff]  }
 0x1ee   :  { %v1889_v5 = vmax.f32 %v1675_v50, %v1810_v3  ;;  %v1677_v63 = vpop.f32.mrb[13].mxu0  ;;  %v1812_v6 = vpop.f32.mrb[13].mxu1  ;;  %2163 = vmatmul.mubr.bf16.vlgmr.msra.gmra.mrb[28].mxu0 %v2036_v4  ;;  %v4975_v50 = vld [vmem:[%s6445_s3 + $0x54] ss:$8 sps:$4 sm:$0xff]  }
 0x1ef   :  { %v1978_v7 = vmax.f32 %v1955_v39, %v1956_v0  ;;  %v1890_v9 = vmax.f32 %v1677_v63, %v1812_v6  ;;  %v1679_v10 = vpop.f32.mrb[14].mxu0  ;;  %v1814_v11 = vpop.f32.mrb[14].mxu1  ;;  %2294 = vmatpush1.bf16.msra.mxu0 %v4958_v59  ;;  %2172 = vmatprep.mubr.bf16.mxu0 %v5114_v1 }
 0x1f0   :  { %v1929_v14 = vadd.f32 %v5837_v46, %v1889_v5  ;;  %v1891_v15 = vmax.f32 %v1679_v10, %v1814_v11  ;;  %v1681_v16 = vpop.f32.mrb[15].mxu0  ;;  %v1816_v21 = vpop.f32.mrb[15].mxu1  ;;  %2295 = vmatprep.subr.bf16.mxu0 %v4963_v60 }
 0x1f1   :  { %v5876_v20 = vpack.c.bf16 %v1978_v7, %v1977_v61  ;;  %v1930_v22 = vadd.f32 %v5841_v51, %v1890_v9  ;;  %v1892_v33 = vmax.f32 %v1681_v16, %v1816_v21  ;;  %v4970_v61 = vld [vmem:[%s6445_s3 + $0x40] ss:$8 sps:$4 sm:$0xff]   ;;  %v4973_v16 = vld [vmem:[%s6445_s3 + $0x50] ss:$8 sps:$4 sm:$0xff]  }
 0x1f2   :  { %v1957_v23 = vmax.f32 %v1929_v14, 0.0  ;;  %v1931_v28 = vadd.f32 %v5837_v46, %v1891_v15 }
 0x1f3   :  { %v1958_v43 = vmax.f32 %v1930_v22, 0.0  ;;  %v1932_v55 = vadd.f32 %v5841_v51, %v1892_v33  ;;  %2296 = vmatpush1.bf16.msra.mxu0 %v4961_v13  ;;  %v2037_v2 = vrot.slane %v5876_v20, 4 }
 0x1f4   :  { %v1959_v17 = vmax.f32 %v1931_v28, 0.0  ;;  %2297 = vmatprep.subr.bf16.mxu0 %v4966_v19 }
 0x1f5   :  { %v1979_v30 = vmax.f32 %v1957_v23, %v1958_v43  ;;  %v1960_v38 = vmax.f32 %v1932_v55, 0.0  ;;  %v1685_v31 = vpop.f32.mrb[16].mxu0  ;;  %v1820_v25 = vpop.f32.mrb[16].mxu1  ;;  %v5889_v32 = vsel %vm2033_vm0, %v2035_v58, %v2037_v2  ;;  %v4978_v23 = vld [vmem:[%s6445_s3 + $0x64] ss:$8 sps:$4 sm:$0xff]  }
 0x1f6   :  { %v1893_v49 = vmax.f32 %v1685_v31, %v1820_v25  ;;  %v1687_v62 = vpop.f32.mrb[17].mxu0  ;;  %v1822_v8 = vpop.f32.mrb[17].mxu1  ;;  %2173 = vmatmul.mubr.bf16.gmra.mrb[32].mxu0 %v5889_v32  ;;  %v4981_v25 = vld [vmem:[%s6445_s3 + $0x74] ss:$8 sps:$4 sm:$0xff]  }
 0x1f7   :  { %v1980_v12 = vmax.f32 %v1959_v17, %v1960_v38  ;;  %v1894_v18 = vmax.f32 %v1687_v62, %v1822_v8  ;;  %v1689_v34 = vpop.f32.mrb[18].mxu0  ;;  %v1824_v35 = vpop.f32.mrb[18].mxu1  ;;  %2298 = vmatpush1.bf16.msra.mxu0 %v4964_v24  ;;  %2182 = vmatprep.mubr.bf16.mxu0 %v5114_v1  ;;  %v4976_v38 = vld [vmem:[%s6445_s3 + $0x60] ss:$8 sps:$4 sm:$0xff]  }
 0x1f8   :  { %v1933_v36 = vadd.f32 %v5837_v46, %v1893_v49  ;;  %v1895_v44 = vmax.f32 %v1689_v34, %v1824_v35  ;;  %v1691_v48 = vpop.f32.mrb[19].mxu0  ;;  %v1826_v52 = vpop.f32.mrb[19].mxu1  ;;  %2299 = vmatprep.subr.bf16.mxu0 %v4969_v27 }
 0x1f9   :  { %v5900_v54 = vpack.c.bf16 %v1980_v12, %v1979_v30  ;;  %v1934_v56 = vadd.f32 %v5841_v51, %v1894_v18  ;;  %v1896_v29 = vmax.f32 %v1691_v48, %v1826_v52 }
 0x1fa   :  { %v1961_v57 = vmax.f32 %v1933_v36, 0.0  ;;  %v1935_v58 = vadd.f32 %v5837_v46, %v1895_v44 }
 0x1fb   :  { %v1962_v59 = vmax.f32 %v1934_v56, 0.0  ;;  %v1936_v39 = vadd.f32 %v5841_v51, %v1896_v29  ;;  %v2039_v60 = vrot.slane %v5900_v54, 4  ;;  %2300 = vmatpush1.bf16.msra.mxu0 %v4967_v37 }
 0x1fc   :  { %v1963_v0 = vmax.f32 %v1935_v58, 0.0  ;;  %2301 = vmatprep.subr.bf16.mxu0 %v4972_v53  ;;  %v4979_v53 = vld [vmem:[%s6445_s3 + $0x70] ss:$8 sps:$4 sm:$0xff]  }
 0x1fd   :  { %v1981_v3 = vmax.f32 %v1961_v57, %v1962_v59  ;;  %v1964_v4 = vmax.f32 %v1936_v39, 0.0  ;;  %v1695_v5 = vpop.f32.mrb[20].mxu0  ;;  %v1830_v63 = vpop.f32.mrb[20].mxu1  ;;  %v5913_v6 = vsel %vm2033_vm0, %v2037_v2, %v2039_v60  ;;  %v4984_v59 = vld [vmem:[%s6445_s3 + $0x104] ss:$8 sps:$4 sm:$0xff]  }
 0x1fe   :  { %v1897_v7 = vmax.f32 %v1695_v5, %v1830_v63  ;;  %v1697_v9 = vpop.f32.mrb[21].mxu0  ;;  %v1832_v10 = vpop.f32.mrb[21].mxu1  ;;  %2183 = vmatmul.mubr.bf16.gmra.mrb[36].mxu0 %v5913_v6 }
 0x1ff   :  { %v1982_v11 = vmax.f32 %v1963_v0, %v1964_v4  ;;  %v1898_v13 = vmax.f32 %v1697_v9, %v1832_v10  ;;  %v1699_v14 = vpop.f32.mrb[22].mxu0  ;;  %v1834_v15 = vpop.f32.mrb[22].mxu1  ;;  %2302 = vmatpush1.bf16.msra.mxu0 %v4970_v61  ;;  %2192 = vmatprep.mubr.bf16.mxu0 %v5114_v1 }
 0x200   :  { %v1937_v21 = vadd.f32 %v5837_v46, %v1897_v7  ;;  %v1899_v19 = vmax.f32 %v1699_v14, %v1834_v15  ;;  %v1701_v22 = vpop.f32.mrb[23].mxu0  ;;  %v1836_v33 = vpop.f32.mrb[23].mxu1  ;;  %2303 = vmatprep.subr.bf16.mxu0 %v4975_v50  ;;  %v4987_v14 = vld [vmem:[%s6445_s3 + $0x114] ss:$8 sps:$4 sm:$0xff]  }
 0x201   :  { %v5924_v28 = vpack.c.bf16 %v1982_v11, %v1981_v3  ;;  %v1938_v43 = vadd.f32 %v5841_v51, %v1898_v13  ;;  %v1900_v55 = vmax.f32 %v1701_v22, %v1836_v33  ;;  %v4991_v22 = vld [vmem:[%s6445_s3 + $0x130] ss:$8 sps:$4 sm:$0xff]   ;;  %v4996_v33 = vld [vmem:[%s6445_s3 + $0x144] ss:$8 sps:$4 sm:$0xff]  }
 0x202   :  { %v1965_v2 = vmax.f32 %v1937_v21, 0.0  ;;  %v1939_v24 = vadd.f32 %v5837_v46, %v1899_v19  ;;  %v4990_v21 = vld [vmem:[%s6445_s3 + $0x124] ss:$8 sps:$4 sm:$0xff]   ;;  %v4988_v19 = vld [vmem:[%s6445_s3 + $0x120] ss:$8 sps:$4 sm:$0xff]  }
 0x203   :  { %v1966_v17 = vmax.f32 %v1938_v43, 0.0  ;;  %v1940_v27 = vadd.f32 %v5841_v51, %v1900_v55  ;;  %v2041_v30 = vrot.slane %v5924_v28, 4  ;;  %2304 = vmatpush1.bf16.msra.mxu0 %v4973_v16  ;;  %v4985_v16 = vld [vmem:[%s6445_s3 + $0x110] ss:$8 sps:$4 sm:$0xff]   ;;  %v4999_v43 = vld [vmem:[%s6445_s3 + $0x154] ss:$8 sps:$4 sm:$0xff]  }
 0x204   :  { %v1967_v31 = vmax.f32 %v1939_v24, 0.0  ;;  %2305 = vmatprep.subr.bf16.mxu0 %v4978_v23  ;;  %v4994_v23 = vld [vmem:[%s6445_s3 + $0x140] ss:$8 sps:$4 sm:$0xff]   ;;  %v4997_v55 = vld [vmem:[%s6445_s3 + $0x150] ss:$8 sps:$4 sm:$0xff]  }
 0x205   :  { %v1983_v49 = vmax.f32 %v1965_v2, %v1966_v17  ;;  %v1968_v62 = vmax.f32 %v1940_v27, 0.0  ;;  %v1705_v8 = vpop.f32.mrb[24].mxu0  ;;  %v1840_v12 = vpop.f32.mrb[24].mxu1  ;;  %v5937_v18 = vsel %vm2033_vm0, %v2039_v60, %v2041_v30  ;;  %v5002_v2 = vld [vmem:[%s6445_s3 + $0x164] ss:$8 sps:$4 sm:$0xff]  }
 0x206   :  { %v1901_v34 = vmax.f32 %v1705_v8, %v1840_v12  ;;  %v1707_v35 = vpop.f32.mrb[25].mxu0  ;;  %v1842_v37 = vpop.f32.mrb[25].mxu1  ;;  %2193 = vmatmul.mubr.bf16.gmra.mrb[40].mxu0 %v5937_v18  ;;  %v5000_v24 = vld [vmem:[%s6445_s3 + $0x160] ss:$8 sps:$4 sm:$0xff]   ;;  %v5005_v17 = vld [vmem:[%s6445_s3 + $0x174] ss:$8 sps:$4 sm:$0xff]  }
 0x207   :  { %v1984_v36 = vmax.f32 %v1967_v31, %v1968_v62  ;;  %v1902_v44 = vmax.f32 %v1707_v35, %v1842_v37  ;;  %v1709_v48 = vpop.f32.mrb[26].mxu0  ;;  %v1844_v52 = vpop.f32.mrb[26].mxu1  ;;  %2202 = vmatprep.mubr.bf16.mxu0 %v5114_v1  ;;  %2306 = vmatpush1.bf16.msra.mxu0 %v4976_v38  ;;  %v5003_v27 = vld [vmem:[%s6445_s3 + $0x170] ss:$8 sps:$4 sm:$0xff]   ;;  %v5008_v38 = vld [vmem:[%s6445_s3 + $0x184] ss:$8 sps:$4 sm:$0xff]  }
 0x208   :  { %v1941_v56 = vadd.f32 %v5837_v46, %v1901_v34  ;;  %v1903_v29 = vmax.f32 %v1709_v48, %v1844_v52  ;;  %v1711_v57 = vpop.f32.mrb[27].mxu0  ;;  %v1846_v58 = vpop.f32.mrb[27].mxu1  ;;  %2307 = vmatprep.subr.bf16.mxu0 %v4981_v25  ;;  %v5115_v31 = vmov 0.0   ;;  %v5055_v25 = vld [vmem:[%s6447_s5 + $0x48] sm:$0xff]   ;;  %v5057_v62 = vld [vmem:[%s6447_s5 + $0x58] sm:$0xff]   ;;  %v5058_v34 = vld [vmem:[%s6447_s5 + $0x60] sm:$0xff]  }
 0x209   :  { %v5948_v39 = vpack.c.bf16 %v1984_v36, %v1983_v49  ;;  %v1942_v60 = vadd.f32 %v5841_v51, %v1902_v44  ;;  %v1904_v61 = vmax.f32 %v1711_v57, %v1846_v58  ;;  %4337 = vmatprep.subr.bf16.mxu1 %v5115_v31  ;;  %v5056_v49 = vld [vmem:[%s6447_s5 + $0x50] sm:$0xff]   ;;  %v5006_v8 = vld [vmem:[%s6445_s3 + $0x180] ss:$8 sps:$4 sm:$0xff]   ;;  %v5014_v37 = vld [vmem:[%s6445_s3 + $0x1a4] ss:$8 sps:$4 sm:$0xff]   ;;  %4353 = vmatprep.mubr.msk.bf16.mxu1 %vm5116_vm1, %v5115_v31 }
 0x20a   :  { %v1969_v0 = vmax.f32 %v1941_v56, 0.0  ;;  %v1943_v50 = vadd.f32 %v5837_v46, %v1903_v29  ;;  %v4982_v46 = vld [vmem:[%s6445_s3 + $0x100] ss:$8 sps:$4 sm:$0xff]   ;;  %v5011_v12 = vld [vmem:[%s6445_s3 + $0x194] ss:$8 sps:$4 sm:$0xff]  }
 0x20b   :  { %v1970_v3 = vmax.f32 %v1942_v60, 0.0  ;;  %v1944_v4 = vadd.f32 %v5841_v51, %v1904_v61  ;;  %v2043_v5 = vrot.slane %v5948_v39, 4  ;;  %2308 = vmatpush1.bf16.msra.mxu0 %v4979_v53  ;;  %v5009_v35 = vld [vmem:[%s6445_s3 + $0x190] ss:$8 sps:$4 sm:$0xff]   ;;  %v5012_v36 = vld [vmem:[%s6445_s3 + $0x1a0] ss:$8 sps:$4 sm:$0xff]  }
 0x20c   :  { %v1971_v63 = vmax.f32 %v1943_v50, 0.0  ;;  %2473 = vmatprep.subr.bf16.mxu0 %v4984_v59  ;;  %v5017_v44 = vld [vmem:[%s6445_s3 + $0x1b4] ss:$8 sps:$4 sm:$0xff]   ;;  %v5020_v48 = vld [vmem:[%s6445_s3 + $0x1c4] ss:$8 sps:$4 sm:$0xff]  }
 0x20d   :  { %v1985_v7 = vmax.f32 %v1969_v0, %v1970_v3  ;;  %v1972_v9 = vmax.f32 %v1944_v4, 0.0  ;;  %v5955_v10 = vsel %vm2033_vm0, %v2041_v30, %v2043_v5  ;;  %v5054_v30 = vld [vmem:[%s6447_s5 + $0x40] sm:$0xff]   ;;  %v5023_v53 = vld [vmem:[%s6445_s3 + $0x1d4] ss:$8 sps:$4 sm:$0xff]   ;;  %v5021_v56 = vld [vmem:[%s6445_s3 + $0x1d0] ss:$8 sps:$4 sm:$0xff]  }
 0x20e   :  { %2203 = vmatmul.mubr.bf16.gmra.mrb[44].mxu0 %v5955_v10  ;;  %4338 = vmatpush3.bf16.msra.mxu1 %v5054_v30  ;;  %v5018_v52 = vld [vmem:[%s6445_s3 + $0x1c0] ss:$8 sps:$4 sm:$0xff]   ;;  %v5026_v29 = vld [vmem:[%s6445_s3 + $0x1e4] ss:$8 sps:$4 sm:$0xff]   ;;  %v5029_v58 = vld [vmem:[%s6445_s3 + $0x1f4] ss:$8 sps:$4 sm:$0xff]  }
 0x20f   :  { %v1986_v11 = vmax.f32 %v1971_v63, %v1972_v9  ;;  %2325 = vmatprep.mubr.bf16.mxu0 %v5114_v1  ;;  %4339 = vmatprep.subr.bf16.mxu1 %v5115_v31  ;;  %v5024_v57 = vld [vmem:[%s6445_s3 + $0x1e0] ss:$8 sps:$4 sm:$0xff]   ;;  %v5027_v59 = vld [vmem:[%s6445_s3 + $0x1f0] ss:$8 sps:$4 sm:$0xff]   ;;  %v5032_v60 = vld [vmem:[%s6445_s3 + $0x204] ss:$8 sps:$4 sm:$0xff]  }
 0x210   :  { %v5030_v61 = vld [vmem:[%s6445_s3 + $0x200] ss:$8 sps:$4 sm:$0xff]   ;;  %v5035_v0 = vld [vmem:[%s6445_s3 + $0x214] ss:$8 sps:$4 sm:$0xff]   ;;  %v5033_v50 = vld [vmem:[%s6445_s3 + $0x210] ss:$8 sps:$4 sm:$0xff]  }
 0x211   :  { %v5959_v13 = vpack.c.bf16 %v1986_v11, %v1985_v7  ;;  %v5038_v3 = vld [vmem:[%s6445_s3 + $0x224] ss:$8 sps:$4 sm:$0xff]   ;;  %v5036_v4 = vld [vmem:[%s6445_s3 + $0x220] ss:$8 sps:$4 sm:$0xff]   ;;  %v5045_v9 = vld [vmem:[%s6445_s3 + $0x250] ss:$8 sps:$4 sm:$0xff]  }
 0x212   :  { %4340 = vmatpush3.bf16.msra.mxu1 %v5055_v25  ;;  %v5044_v63 = vld [vmem:[%s6445_s3 + $0x244] ss:$8 sps:$4 sm:$0xff]   ;;  %v5042_v7 = vld [vmem:[%s6445_s3 + $0x240] ss:$8 sps:$4 sm:$0xff]  }
 0x213   :  { %v2594_v51 = vrot.slane %v5959_v13, 4  ;;  %4341 = vmatprep.subr.bf16.mxu1 %v5115_v31  ;;  %v5050_v11 = vld [vmem:[%s6445_s3 + $0x264] ss:$8 sps:$4 sm:$0xff]  }
 0x215   :  { %v5969_v15 = vsel %vm2033_vm0, %v2043_v5, %v2594_v51  ;;  %v5039_v5 = vld [vmem:[%s6445_s3 + $0x230] ss:$8 sps:$4 sm:$0xff]  }
 0x216   :  { %2326 = vmatmul.mubr.bf16.vlgmr.msra.gmra.mrb[28].mxu0 %v5848_v26  ;;  %v4993_v26 = vld [vmem:[%s6445_s3 + $0x134] ss:$8 sps:$4 sm:$0xff]   ;;  %4342 = vmatpush3.bf16.msra.mxu1 %v5056_v49  ;;  %v5051_v51 = vld [vmem:[%s6445_s3 + $0x270] ss:$8 sps:$4 sm:$0xff]  }
 0x217   :  { %2474 = vmatpush1.bf16.msra.mxu0 %v4982_v46  ;;  %2335 = vmatprep.mubr.bf16.mxu0 %v5114_v1  ;;  %v5048_v46 = vld [vmem:[%s6445_s3 + $0x260] ss:$8 sps:$4 sm:$0xff]  }
 0x218   :  { %2475 = vmatprep.subr.bf16.mxu0 %v4987_v14  ;;  %4343 = vmatprep.subr.bf16.mxu1 %v5115_v31 }
 0x21a   :  { %4344 = vmatpush3.bf16.msra.mxu1 %v5057_v62 }
 0x21b   :  { %2476 = vmatpush1.bf16.msra.mxu0 %v4985_v16  ;;  %4345 = vmatprep.subr.bf16.mxu1 %v5115_v31 }
 0x21c   :  { %2477 = vmatprep.subr.bf16.mxu0 %v4990_v21 }
 0x21e   :  { %2336 = vmatmul.mubr.bf16.gmra.mrb[32].mxu0 %v5854_v47  ;;  %4346 = vmatpush3.bf16.msra.mxu1 %v5058_v34 }
 0x21f   :  { %2478 = vmatpush1.bf16.msra.mxu0 %v4988_v19  ;;  %2345 = vmatprep.mubr.bf16.mxu0 %v5114_v1 }
 0x220   :  { %2479 = vmatprep.subr.bf16.mxu0 %v4993_v26  ;;  %4347 = vmatprep.subr.bf16.mxu1 %v5115_v31 }
 0x223   :  { %2480 = vmatpush1.bf16.msra.mxu0 %v4991_v22 }
 0x224   :  { %2481 = vmatprep.subr.bf16.mxu0 %v4996_v33 }
 0x226   :  { %2346 = vmatmul.mubr.bf16.gmra.mrb[36].mxu0 %v5876_v20 }
 0x227   :  { %2482 = vmatpush1.bf16.msra.mxu0 %v4994_v23  ;;  %2355 = vmatprep.mubr.bf16.mxu0 %v5114_v1 }
 0x228   :  { %2483 = vmatprep.subr.bf16.mxu0 %v4999_v43 }
 0x22b   :  { %2484 = vmatpush1.bf16.msra.mxu0 %v4997_v55 }
 0x22c   :  { %2485 = vmatprep.subr.bf16.mxu0 %v5002_v2 }
 0x22e   :  { %2356 = vmatmul.mubr.bf16.gmra.mrb[40].mxu0 %v5900_v54 }
 0x22f   :  { %2365 = vmatprep.mubr.bf16.mxu0 %v5114_v1  ;;  %2486 = vmatpush1.bf16.msra.mxu0 %v5000_v24 }
 0x230   :  { %2487 = vmatprep.subr.bf16.mxu0 %v5005_v17 }
 0x233   :  { %2488 = vmatpush1.bf16.msra.mxu0 %v5003_v27 }
 0x234   :  { %2677 = vmatprep.subr.bf16.mxu0 %v5008_v38 }
 0x236   :  { %2366 = vmatmul.mubr.bf16.gmra.mrb[44].mxu0 %v5924_v28 }
 0x237   :  { %2505 = vmatprep.mubr.bf16.mxu0 %v5114_v1 }
 0x23e   :  { %2506 = vmatmul.mubr.bf16.vlgmr.msra.gmra.mrb[28].mxu0 %v5854_v47  ;;  %v5015_v47 = vld [vmem:[%s6445_s3 + $0x1b0] ss:$8 sps:$4 sm:$0xff]  }
 0x23f   :  { %2678 = vmatpush1.bf16.msra.mxu0 %v5006_v8  ;;  %2515 = vmatprep.mubr.bf16.mxu0 %v5114_v1 }
 0x240   :  { %2679 = vmatprep.subr.bf16.mxu0 %v5011_v12 }
 0x243   :  { %2680 = vmatpush1.bf16.msra.mxu0 %v5009_v35 }
 0x244   :  { %2681 = vmatprep.subr.bf16.mxu0 %v5014_v37 }
 0x246   :  { %2516 = vmatmul.mubr.bf16.gmra.mrb[32].mxu0 %v5876_v20 }
 0x247   :  { %2682 = vmatpush1.bf16.msra.mxu0 %v5012_v36  ;;  %2525 = vmatprep.mubr.bf16.mxu0 %v5114_v1 }
 0x248   :  { %2683 = vmatprep.subr.bf16.mxu0 %v5017_v44 }
 0x24b   :  { %2684 = vmatpush1.bf16.msra.mxu0 %v5015_v47 }
 0x24c   :  { %2685 = vmatprep.subr.bf16.mxu0 %v5020_v48 }
 0x24e   :  { %2526 = vmatmul.mubr.bf16.gmra.mrb[36].mxu0 %v5900_v54 }
 0x24f   :  { %2686 = vmatpush1.bf16.msra.mxu0 %v5018_v52  ;;  %2535 = vmatprep.mubr.bf16.mxu0 %v5114_v1 }
 0x250   :  { %2687 = vmatprep.subr.bf16.mxu0 %v5023_v53 }
 0x253   :  { %2688 = vmatpush1.bf16.msra.mxu0 %v5021_v56 }
 0x254   :  { %2689 = vmatprep.subr.bf16.mxu0 %v5026_v29 }
 0x256   :  { %2536 = vmatmul.mubr.bf16.gmra.mrb[40].mxu0 %v5924_v28 }
 0x257   :  { %2545 = vmatprep.mubr.bf16.mxu0 %v5114_v1  ;;  %2690 = vmatpush1.bf16.msra.mxu0 %v5024_v57 }
 0x258   :  { %2691 = vmatprep.subr.bf16.mxu0 %v5029_v58  ;;  %v5062_v58 = vld [vmem:[%s6447_s5] sm:$0xff]  }
 0x25b   :  { %2692 = vmatpush1.bf16.msra.mxu0 %v5027_v59 }
 0x25c   :  { %2877 = vmatprep.subr.bf16.mxu0 %v5032_v60 }
 0x25e   :  { %2546 = vmatmul.mubr.bf16.gmra.mrb[44].mxu0 %v5948_v39 }
 0x25f   :  { %2709 = vmatprep.mubr.bf16.mxu0 %v5114_v1 }
 0x266   :  { %2710 = vmatmul.mubr.bf16.vlgmr.msra.gmra.mrb[28].mxu0 %v5889_v32  ;;  %v5041_v32 = vld [vmem:[%s6445_s3 + $0x234] ss:$8 sps:$4 sm:$0xff]  }
 0x267   :  { %2878 = vmatpush1.bf16.msra.mxu0 %v5030_v61  ;;  %2719 = vmatprep.mubr.bf16.mxu0 %v5114_v1 }
 0x268   :  { %2879 = vmatprep.subr.bf16.mxu0 %v5035_v0 }
 0x26b   :  { %2880 = vmatpush1.bf16.msra.mxu0 %v5033_v50 }
 0x26c   :  { %2881 = vmatprep.subr.bf16.mxu0 %v5038_v3 }
 0x26e   :  { %2720 = vmatmul.mubr.bf16.gmra.mrb[32].mxu0 %v5913_v6  ;;  %v5047_v6 = vld [vmem:[%s6445_s3 + $0x254] ss:$8 sps:$4 sm:$0xff]  }
 0x26f   :  { %2882 = vmatpush1.bf16.msra.mxu0 %v5036_v4  ;;  %2729 = vmatprep.mubr.bf16.mxu0 %v5114_v1  ;;  %v5063_v4 = vld [vmem:[%s6447_s5 + $0x8] sm:$0xff]  }
 0x270   :  { %2883 = vmatprep.subr.bf16.mxu0 %v5041_v32 }
 0x273   :  { %2884 = vmatpush1.bf16.msra.mxu0 %v5039_v5 }
 0x274   :  { %2885 = vmatprep.subr.bf16.mxu0 %v5044_v63 }
 0x276   :  { %2730 = vmatmul.mubr.bf16.gmra.mrb[36].mxu0 %v5937_v18  ;;  %v5053_v18 = vld [vmem:[%s6445_s3 + $0x274] ss:$8 sps:$4 sm:$0xff]  }
 0x277   :  { %2886 = vmatpush1.bf16.msra.mxu0 %v5042_v7  ;;  %2739 = vmatprep.mubr.bf16.mxu0 %v5114_v1 }
 0x278   :  { %2887 = vmatprep.subr.bf16.mxu0 %v5047_v6 }
 0x27b   :  { %2888 = vmatpush1.bf16.msra.mxu0 %v5045_v9 }
 0x27c   :  { %2889 = vmatprep.subr.bf16.mxu0 %v5050_v11 }
 0x27e   :  { %2740 = vmatmul.mubr.bf16.gmra.mrb[40].mxu0 %v5955_v10 }
 0x27f   :  { %2749 = vmatprep.mubr.bf16.mxu0 %v5114_v1  ;;  %2890 = vmatpush1.bf16.msra.mxu0 %v5048_v46 }
 0x280   :  { %2891 = vmatprep.subr.bf16.mxu0 %v5053_v18 }
 0x283   :  { %2892 = vmatpush1.bf16.msra.mxu0 %v5051_v51 }
 0x286   :  { %2750 = vmatmul.mubr.bf16.gmra.mrb[44].mxu0 %v5969_v15 }
 0x287   :  { %2909 = vmatprep.mubr.bf16.mxu0 %v5114_v1 }
 0x28e   :  { %2910 = vmatmul.mubr.bf16.vlgmr.msra.gmra.mrb[28].mxu0 %v5876_v20  ;;  %v5059_v20 = vld [vmem:[%s6447_s5 + $0x68] sm:$0xff]  }
 0x28f   :  { %2919 = vmatprep.mubr.bf16.mxu0 %v5114_v1  ;;  %4348 = vmatpush3.bf16.msra.mxu1 %v5059_v20  ;;  %v5064_v20 = vld [vmem:[%s6447_s5 + $0x10] sm:$0xff]  }
 0x290   :  { %4349 = vmatprep.subr.bf16.mxu1 %v5115_v31 }
 0x296   :  { %2920 = vmatmul.mubr.bf16.gmra.mrb[32].mxu0 %v5900_v54  ;;  %v5060_v54 = vld [vmem:[%s6447_s5 + $0x70] sm:$0xff]  }
 0x297   :  { %2929 = vmatprep.mubr.bf16.mxu0 %v5114_v1  ;;  %4350 = vmatpush3.bf16.msra.mxu1 %v5060_v54 }
 0x298   :  { %4351 = vmatprep.subr.bf16.mxu1 %v5115_v31 }
 0x29e   :  { %2930 = vmatmul.mubr.bf16.gmra.mrb[36].mxu0 %v5924_v28  ;;  %v2980_v28 = vld [vmem:[%s6448_s4] sm:$0x3] }
 0x29f   :  { %2939 = vmatprep.mubr.bf16.mxu0 %v5114_v1  ;;  %v6189_v10 = vrot.slane %v2980_v28, %v1913_v45 }
 0x2a6   :  { %2940 = vmatmul.mubr.bf16.gmra.mrb[40].mxu0 %v5948_v39  ;;  %v6185_v39 = vrot.slane %v2980_v28, %v1909_v42 }
 0x2a7   :  { %2949 = vmatprep.mubr.bf16.mxu0 %v5114_v1  ;;  %v5061_v1 = vld [vmem:[%s6447_s5 + $0x78] sm:$0xff]  }
 0x2a8   :  { %4352 = vmatpush3.bf16.msra.mxu1 %v5061_v1 }
 0x2a9   :  { %4357 = vmatprep.subr.bf16.mxu1 %v5115_v31 }
 0x2ae   :  { %2950 = vmatmul.mubr.bf16.gmra.mrb[44].mxu0 %v5959_v13 }
 0x361   :  { %v2911_v13 = vpop.f32.mrb[28].mxu0 }
 0x362   :  { %v2992_v14 = vadd.f32 %v6185_v39, %v2911_v13  ;;  %v2913_v15 = vpop.f32.mrb[29].mxu0 }
 0x363   :  { %v2993_v16 = vadd.f32 %v6189_v10, %v2913_v15  ;;  %v2915_v21 = vpop.f32.mrb[30].mxu0  ;;  %v5065_v15 = vld [vmem:[%s6447_s5 + $0x18] sm:$0xff]  }
 0x364   :  { %v3012_v19 = vmax.f32 %v2992_v14, 0.0  ;;  %v2994_v26 = vadd.f32 %v6185_v39, %v2915_v21  ;;  %v2917_v22 = vpop.f32.mrb[31].mxu0 }
 0x365   :  { %v3013_v33 = vmax.f32 %v2993_v16, 0.0  ;;  %v2995_v23 = vadd.f32 %v6189_v10, %v2917_v22 }
 0x366   :  { %v3014_v42 = vmax.f32 %v2994_v26, 0.0 }
 0x367   :  { %v3032_v43 = vmax.f32 %v3012_v19, %v3013_v33  ;;  %v3015_v55 = vmax.f32 %v2995_v23, 0.0 }
 0x369   :  { %v3033_v41 = vmax.f32 %v3014_v42, %v3015_v55  ;;  %v2921_v45 = vpop.f32.mrb[32].mxu0 }
 0x36a   :  { %v2996_v2 = vadd.f32 %v6185_v39, %v2921_v45  ;;  %v2923_v24 = vpop.f32.mrb[33].mxu0 }
 0x36b   :  { %v6196_v17 = vmax.f32 %v3032_v43, %v3033_v41  ;;  %v2997_v27 = vadd.f32 %v6189_v10, %v2923_v24  ;;  %v2925_v30 = vpop.f32.mrb[34].mxu0  ;;  %v5066_v41 = vld [vmem:[%s6447_s5 + $0x20] sm:$0xff]  }
 0x36c   :  { %v3016_v38 = vmax.f32 %v2996_v2, 0.0  ;;  %v2998_v25 = vadd.f32 %v6185_v39, %v2925_v30  ;;  %v2927_v49 = vpop.f32.mrb[35].mxu0 }
 0x36d   :  { %v3017_v62 = vmax.f32 %v2997_v27, 0.0  ;;  %v2999_v8 = vadd.f32 %v6189_v10, %v2927_v49  ;;  %v5069_v49 = vld [vmem:[%s6447_s5 + $0x38] sm:$0xff]  }
 0x36e   :  { %v3018_v12 = vmax.f32 %v2998_v25, 0.0 }
 0x36f   :  { %v3034_v34 = vmax.f32 %v3016_v38, %v3017_v62  ;;  %v3019_v35 = vmax.f32 %v2999_v8, 0.0  ;;  %v5067_v38 = vld [vmem:[%s6447_s5 + $0x28] sm:$0xff]   ;;  %v5070_v62 = vld [vmem:[%s6447_s5 + $0x80] sm:$0xff]   ;;  %v3043_v8 = vpack.c.bf16 %v6196_v17, %v6196_v17  ;;  %v5073_v17 = vld [vmem:[%s6447_s5 + $0x98] sm:$0xff]  }
 0x371   :  { %v3035_v37 = vmax.f32 %v3018_v12, %v3019_v35  ;;  %v2931_v36 = vpop.f32.mrb[36].mxu0  ;;  %v5071_v12 = vld [vmem:[%s6447_s5 + $0x88] sm:$0xff]   ;;  %v5074_v35 = vld [vmem:[%s6447_s5 + $0xa0] sm:$0xff]  }
 0x372   :  { %v3000_v44 = vadd.f32 %v6185_v39, %v2931_v36  ;;  %v2933_v47 = vpop.f32.mrb[37].mxu0  ;;  %v5076_v36 = vld [vmem:[%s6447_s5 + $0xb0] sm:$0xff]  }
 0x373   :  { %v3060_v48 = vmax.f32 %v3034_v34, %v3035_v37  ;;  %v3001_v52 = vadd.f32 %v6189_v10, %v2933_v47  ;;  %v2935_v53 = vpop.f32.mrb[38].mxu0  ;;  %v5072_v34 = vld [vmem:[%s6447_s5 + $0x90] sm:$0xff]   ;;  %v5075_v37 = vld [vmem:[%s6447_s5 + $0xa8] sm:$0xff]   ;;  %v5078_v47 = vld [vmem:[%s6447_s5 + $0xc0] sm:$0xff]  }
 0x374   :  { %v3020_v56 = vmax.f32 %v3000_v44, 0.0  ;;  %v3002_v29 = vadd.f32 %v6185_v39, %v2935_v53  ;;  %v2937_v57 = vpop.f32.mrb[39].mxu0  ;;  %v5077_v44 = vld [vmem:[%s6447_s5 + $0xb8] sm:$0xff]   ;;  %v5080_v53 = vld [vmem:[%s6447_s5 + $0xd0] sm:$0xff]  }
 0x375   :  { %v3061_v59 = vpack.c.bf16 %v3060_v48, %v3060_v48  ;;  %v3021_v60 = vmax.f32 %v3001_v52, 0.0  ;;  %v3003_v61 = vadd.f32 %v6189_v10, %v2937_v57  ;;  %v5079_v52 = vld [vmem:[%s6447_s5 + $0xc8] sm:$0xff]  }
 0x376   :  { %v3022_v0 = vmax.f32 %v3002_v29, 0.0  ;;  %v5082_v29 = vld [vmem:[%s6447_s5 + $0xe0] sm:$0xff]   ;;  %v5083_v57 = vld [vmem:[%s6447_s5 + $0xe8] sm:$0xff]  }
 0x377   :  { %v3036_v50 = vmax.f32 %v3020_v56, %v3021_v60  ;;  %v3023_v3 = vmax.f32 %v3003_v61, 0.0  ;;  %4354 = vmatmul.mubr.bf16.vlgmr.msra.gmra.mrb[28].mxu1 %v3061_v59  ;;  %v5081_v56 = vld [vmem:[%s6447_s5 + $0xd8] sm:$0xff]   ;;  %v5086_v60 = vld [vmem:[%s6447_s5 + $0x100] sm:$0xff]  }
 0x378   :  { %4358 = vmatpush3.bf16.msra.mxu1 %v5062_v58  ;;  %4373 = vmatprep.mubr.msk.bf16.mxu1 %vm5116_vm1, %v5115_v31  ;;  %v5084_v58 = vld [vmem:[%s6447_s5 + $0xf0] sm:$0xff]   ;;  %v5085_v59 = vld [vmem:[%s6447_s5 + $0xf8] sm:$0xff]  }
 0x379   :  { %v3037_v32 = vmax.f32 %v3022_v0, %v3023_v3  ;;  %v2941_v5 = vpop.f32.mrb[40].mxu0  ;;  %4359 = vmatprep.subr.bf16.mxu1 %v5115_v31  ;;  %v5087_v0 = vld [vmem:[%s6447_s5 + $0x108] sm:$0xff]   ;;  %v5089_v3 = vld [vmem:[%s6447_s5 + $0x118] sm:$0xff]  }
 0x37a   :  { %v3004_v63 = vadd.f32 %v6185_v39, %v2941_v5  ;;  %v2943_v7 = vpop.f32.mrb[41].mxu0  ;;  %v5092_v5 = vld [vmem:[%s6447_s5 + $0x130] sm:$0xff]  }
 0x37b   :  { %v6215_v6 = vmax.f32 %v3036_v50, %v3037_v32  ;;  %v3005_v9 = vadd.f32 %v6189_v10, %v2943_v7  ;;  %v2945_v11 = vpop.f32.mrb[42].mxu0  ;;  %v5088_v50 = vld [vmem:[%s6447_s5 + $0x110] sm:$0xff]   ;;  %v5091_v32 = vld [vmem:[%s6447_s5 + $0x128] sm:$0xff]  }
 0x37c   :  { %v3024_v46 = vmax.f32 %v3004_v63, 0.0  ;;  %v3006_v18 = vadd.f32 %v6185_v39, %v2945_v11  ;;  %4360 = vmatpush3.bf16.msra.mxu1 %v5063_v4  ;;  %v2947_v51 = vpop.f32.mrb[43].mxu0  ;;  %v5090_v4 = vld [vmem:[%s6447_s5 + $0x120] sm:$0xff]   ;;  %v5093_v63 = vld [vmem:[%s6447_s5 + $0x138] sm:$0xff]   ;;  %v5096_v11 = vld [vmem:[%s6449_s7 + $0x10] sm:$0xff]  }
 0x37d   :  { %v3025_v54 = vmax.f32 %v3005_v9, 0.0  ;;  %v3007_v1 = vadd.f32 %v6189_v10, %v2947_v51  ;;  %4361 = vmatprep.subr.bf16.mxu1 %v5115_v31  ;;  %v3256_v48 = vpack.c.bf16 %v6215_v6, %v6215_v6  ;;  %v5094_v6 = vld [vmem:[%s6449_s7] sm:$0xff]   ;;  %v5095_v9 = vld [vmem:[%s6449_s7 + $0x8] sm:$0xff]  }
 0x37e   :  { %v3026_v28 = vmax.f32 %v3006_v18, 0.0  ;;  %v5098_v18 = vld [vmem:[%s6449_s7 + $0x20] sm:$0xff]   ;;  %v5099_v51 = vld [vmem:[%s6449_s7 + $0x28] sm:$0xff]  }
 0x37f   :  { %v3038_v13 = vmax.f32 %v3024_v46, %v3025_v54  ;;  %v3027_v14 = vmax.f32 %v3007_v1, 0.0  ;;  %v5097_v46 = vld [vmem:[%s6449_s7 + $0x18] sm:$0xff]   ;;  %v5100_v54 = vld [vmem:[%s6449_s7 + $0x30] sm:$0xff]  }
 0x380   :  { %4362 = vmatpush3.bf16.msra.mxu1 %v5064_v20 }
 0x381   :  { %v3039_v16 = vmax.f32 %v3026_v28, %v3027_v14  ;;  %v2951_v21 = vpop.f32.mrb[44].mxu0  ;;  %4363 = vmatprep.subr.bf16.mxu1 %v5115_v31  ;;  %v5101_v14 = vld [vmem:[%s6449_s7 + $0x38] sm:$0xff]  }
 0x382   :  { %v3008_v19 = vadd.f32 %v6185_v39, %v2951_v21  ;;  %v2953_v26 = vpop.f32.mrb[45].mxu0 }
 0x383   :  { %v6229_v22 = vmax.f32 %v3038_v13, %v3039_v16  ;;  %v3009_v33 = vadd.f32 %v6189_v10, %v2953_v26  ;;  %v2955_v23 = vpop.f32.mrb[46].mxu0 }
 0x384   :  { %v3028_v42 = vmax.f32 %v3008_v19, 0.0  ;;  %v3010_v43 = vadd.f32 %v6185_v39, %v2955_v23  ;;  %4364 = vmatpush3.bf16.msra.mxu1 %v5065_v15  ;;  %v2957_v55 = vpop.f32.mrb[47].mxu0 }
 0x385   :  { %v3029_v45 = vmax.f32 %v3009_v33, 0.0  ;;  %v3011_v2 = vadd.f32 %v6189_v10, %v2957_v55  ;;  %4365 = vmatprep.subr.bf16.mxu1 %v5115_v31  ;;  %v5068_v10 = vld [vmem:[%s6447_s5 + $0x30] sm:$0xff]   ;;  %v3364_v61 = vpack.c.bf16 %v6229_v22, %v6229_v22 }
 0x386   :  { %v3030_v24 = vmax.f32 %v3010_v43, 0.0 }
 0x387   :  { %v3040_v27 = vmax.f32 %v3028_v42, %v3029_v45  ;;  %v3031_v30 = vmax.f32 %v3011_v2, 0.0 }
 0x388   :  { %4366 = vmatpush3.bf16.msra.mxu1 %v5066_v41 }
 0x389   :  { %v3041_v39 = vmax.f32 %v3030_v24, %v3031_v30  ;;  %4367 = vmatprep.subr.bf16.mxu1 %v5115_v31  ;;  %v4255_v30 = vld [vmem:[%s6451_s6] ss:$0 sm:$0xff] }
 0x38b   :  { %v6242_v25 = vmax.f32 %v3040_v27, %v3041_v39 }
 0x38c   :  { %4368 = vmatpush3.bf16.msra.mxu1 %v5067_v38 }
 0x38d   :  { %4369 = vmatprep.subr.bf16.mxu1 %v5115_v31  ;;  %v3472_v7 = vpack.c.bf16 %v6242_v25, %v6242_v25 }
 0x390   :  { %4370 = vmatpush3.bf16.msra.mxu1 %v5068_v10 }
 0x391   :  { %4371 = vmatprep.subr.bf16.mxu1 %v5115_v31 }
 0x394   :  { %4372 = vmatpush3.bf16.msra.mxu1 %v5069_v49 }
 0x395   :  { %4377 = vmatprep.subr.bf16.mxu1 %v5115_v31 }
 0x397   :  { %4374 = vmatmul.mubr.bf16.vlgmr.msra.gmra.mrb[32].mxu1 %v3043_v8  ;;  %v5102_v8 = vld [vmem:[%s6450_s9] sm:$0xff]  }
 0x398   :  { %4378 = vmatpush3.bf16.msra.mxu1 %v5070_v62  ;;  %4393 = vmatprep.mubr.msk.bf16.mxu1 %vm5116_vm1, %v5115_v31 }
 0x399   :  { %4379 = vmatprep.subr.bf16.mxu1 %v5115_v31 }
 0x39c   :  { %4380 = vmatpush3.bf16.msra.mxu1 %v5071_v12 }
 0x39d   :  { %4381 = vmatprep.subr.bf16.mxu1 %v5115_v31 }
 0x3a0   :  { %4382 = vmatpush3.bf16.msra.mxu1 %v5072_v34  ;;  %v5103_v34 = vld [vmem:[%s6450_s9 + $0x8] sm:$0xff]  }
 0x3a1   :  { %4383 = vmatprep.subr.bf16.mxu1 %v5115_v31 }
 0x3a4   :  { %4384 = vmatpush3.bf16.msra.mxu1 %v5073_v17  ;;  %v5104_v17 = vld [vmem:[%s6450_s9 + $0x10] sm:$0xff]  }
 0x3a5   :  { %4385 = vmatprep.subr.bf16.mxu1 %v5115_v31 }
 0x3a8   :  { %4386 = vmatpush3.bf16.msra.mxu1 %v5074_v35  ;;  %v5105_v35 = vld [vmem:[%s6450_s9 + $0x18] sm:$0xff]  }
 0x3a9   :  { %4387 = vmatprep.subr.bf16.mxu1 %v5115_v31 }
 0x3ac   :  { %4388 = vmatpush3.bf16.msra.mxu1 %v5075_v37  ;;  %v5106_v37 = vld [vmem:[%s6450_s9 + $0x20] sm:$0xff]  }
 0x3ad   :  { %4389 = vmatprep.subr.bf16.mxu1 %v5115_v31 }
 0x3b0   :  { %4390 = vmatpush3.bf16.msra.mxu1 %v5076_v36  ;;  %v5107_v36 = vld [vmem:[%s6450_s9 + $0x28] sm:$0xff]  }
 0x3b1   :  { %4391 = vmatprep.subr.bf16.mxu1 %v5115_v31 }
 0x3b4   :  { %4392 = vmatpush3.bf16.msra.mxu1 %v5077_v44  ;;  %v5108_v44 = vld [vmem:[%s6450_s9 + $0x30] sm:$0xff]  }
 0x3b5   :  { %4397 = vmatprep.subr.bf16.mxu1 %v5115_v31 }
 0x3b7   :  { %4394 = vmatmul.mubr.bf16.vlgmr.msra.gmra.mrb[36].mxu1 %v3256_v48  ;;  %v4256_v48 = vld [vmem:[%s6452_s8] ss:$0 sm:$0xff] }
 0x3b8   :  { %4398 = vmatpush3.bf16.msra.mxu1 %v5078_v47  ;;  %4413 = vmatprep.mubr.msk.bf16.mxu1 %vm5116_vm1, %v5115_v31  ;;  %v5109_v47 = vld [vmem:[%s6450_s9 + $0x38] sm:$0xff]  }
 0x3b9   :  { %4399 = vmatprep.subr.bf16.mxu1 %v5115_v31 }
 0x3bc   :  { %4400 = vmatpush3.bf16.msra.mxu1 %v5079_v52 }
 0x3bd   :  { %4401 = vmatprep.subr.bf16.mxu1 %v5115_v31 }
 0x3c0   :  { %4402 = vmatpush3.bf16.msra.mxu1 %v5080_v53 }
 0x3c1   :  { %4403 = vmatprep.subr.bf16.mxu1 %v5115_v31 }
 0x3c4   :  { %4404 = vmatpush3.bf16.msra.mxu1 %v5081_v56 }
 0x3c5   :  { %4405 = vmatprep.subr.bf16.mxu1 %v5115_v31 }
 0x3c8   :  { %4406 = vmatpush3.bf16.msra.mxu1 %v5082_v29 }
 0x3c9   :  { %4407 = vmatprep.subr.bf16.mxu1 %v5115_v31 }
 0x3cc   :  { %4408 = vmatpush3.bf16.msra.mxu1 %v5083_v57 }
 0x3cd   :  { %4409 = vmatprep.subr.bf16.mxu1 %v5115_v31 }
 0x3d0   :  { %4410 = vmatpush3.bf16.msra.mxu1 %v5084_v58 }
 0x3d1   :  { %4411 = vmatprep.subr.bf16.mxu1 %v5115_v31 }
 0x3d4   :  { %4412 = vmatpush3.bf16.msra.mxu1 %v5085_v59 }
 0x3d5   :  { %4417 = vmatprep.subr.bf16.mxu1 %v5115_v31 }
 0x3d7   :  { %4414 = vmatmul.mubr.bf16.vlgmr.msra.gmra.mrb[40].mxu1 %v3364_v61 }
 0x3d8   :  { %4418 = vmatpush3.bf16.msra.mxu1 %v5086_v60  ;;  %4433 = vmatprep.mubr.msk.bf16.mxu1 %vm5116_vm1, %v5115_v31  ;;  %v3814_v60 = vand.u32 127, %v1907_v40 }
 0x3d9   :  { %4419 = vmatprep.subr.bf16.mxu1 %v5115_v31 }
 0x3da   :  { %vm3815_vm2 = vcmp.lt.s32.totalorder %v3814_v60, 10 }
 0x3dc   :  { %4420 = vmatpush3.bf16.msra.mxu1 %v5087_v0 }
 0x3dd   :  { %4421 = vmatprep.subr.bf16.mxu1 %v5115_v31 }
 0x3e0   :  { %4422 = vmatpush3.bf16.msra.mxu1 %v5088_v50 }
 0x3e1   :  { %4423 = vmatprep.subr.bf16.mxu1 %v5115_v31 }
 0x3e4   :  { %4424 = vmatpush3.bf16.msra.mxu1 %v5089_v3 }
 0x3e5   :  { %4425 = vmatprep.subr.bf16.mxu1 %v5115_v31 }
 0x3e8   :  { %4426 = vmatpush3.bf16.msra.mxu1 %v5090_v4 }
 0x3e9   :  { %4427 = vmatprep.subr.bf16.mxu1 %v5115_v31 }
 0x3ec   :  { %4428 = vmatpush3.bf16.msra.mxu1 %v5091_v32 }
 0x3ed   :  { %4429 = vmatprep.subr.bf16.mxu1 %v5115_v31 }
 0x3f0   :  { %4430 = vmatpush3.bf16.msra.mxu1 %v5092_v5 }
 0x3f1   :  { %4431 = vmatprep.subr.bf16.mxu1 %v5115_v31 }
 0x3f4   :  { %4432 = vmatpush3.bf16.msra.mxu1 %v5093_v63 }
 0x3f5   :  { %4437 = vmatprep.subr.bf16.mxu1 %v5115_v31 }
 0x3f7   :  { %4434 = vmatmul.mubr.bf16.vlgmr.msra.gmra.mrb[44].mxu1 %v3472_v7 }
 0x3f8   :  { %4453 = vmatprep.mubr.msk.bf16.mxu1 %vm5116_vm1, %v5115_v31  ;;  %4438 = vmatpush3.bf16.msra.mxu1 %v5094_v6 }
 0x3f9   :  { %4439 = vmatprep.subr.bf16.mxu1 %v5115_v31 }
 0x3fc   :  { %4440 = vmatpush3.bf16.msra.mxu1 %v5095_v9 }
 0x3fd   :  { %4441 = vmatprep.subr.bf16.mxu1 %v5115_v31 }
 0x400   :  { %4442 = vmatpush3.bf16.msra.mxu1 %v5096_v11 }
 0x401   :  { %4443 = vmatprep.subr.bf16.mxu1 %v5115_v31 }
 0x404   :  { %4444 = vmatpush3.bf16.msra.mxu1 %v5097_v46 }
 0x405   :  { %4445 = vmatprep.subr.bf16.mxu1 %v5115_v31 }
 0x408   :  { %4446 = vmatpush3.bf16.msra.mxu1 %v5098_v18 }
 0x409   :  { %4447 = vmatprep.subr.bf16.mxu1 %v5115_v31 }
 0x40c   :  { %4448 = vmatpush3.bf16.msra.mxu1 %v5099_v51 }
 0x40d   :  { %4449 = vmatprep.subr.bf16.mxu1 %v5115_v31 }
 0x410   :  { %4450 = vmatpush3.bf16.msra.mxu1 %v5100_v54 }
 0x411   :  { %4451 = vmatprep.subr.bf16.mxu1 %v5115_v31 }
 0x414   :  { %4452 = vmatpush3.bf16.msra.mxu1 %v5101_v14 }
 0x415   :  { %4457 = vmatprep.subr.bf16.mxu1 %v5115_v31 }
 0x44a   :  { %v3161_v20 = vpop.f32.mrb[28].mxu1 }
 0x44b   :  { %v4355_v1 = vpop.f32.mrb[29].mxu1 }
 0x44c   :  { %v3164_v28 = vpop.f32.mrb[30].mxu1 }
 0x44d   :  { %v4356_v13 = vpop.f32.mrb[31].mxu1 }
 0x46a   :  { %v3249_v15 = vpop.f32.mrb[32].mxu1 }
 0x46b   :  { %v3250_v16 = vadd.f32 %v3249_v15, %v3161_v20  ;;  %v4375_v21 = vpop.f32.mrb[33].mxu1 }
 0x46c   :  { %v3252_v19 = vpop.f32.mrb[34].mxu1 }
 0x46d   :  { %v4376_v26 = vpop.f32.mrb[35].mxu1 }
 0x48a   :  { %v3356_v22 = vpop.f32.mrb[36].mxu1 }
 0x48b   :  { %v3362_v33 = vadd.f32 %v3356_v22, %v3250_v16  ;;  %v4395_v23 = vpop.f32.mrb[37].mxu1 }
 0x48c   :  { %v3359_v42 = vpop.f32.mrb[38].mxu1 }
 0x48d   :  { %v4396_v43 = vpop.f32.mrb[39].mxu1 }
 0x4aa   :  { %v3464_v55 = vpop.f32.mrb[40].mxu1 }
 0x4ab   :  { %v3470_v41 = vadd.f32 %v3464_v55, %v3362_v33  ;;  %v4415_v45 = vpop.f32.mrb[41].mxu1 }
 0x4ac   :  { %v3467_v2 = vpop.f32.mrb[42].mxu1 }
 0x4ad   :  { %v4416_v24 = vpop.f32.mrb[43].mxu1 }
 0x4ca   :  { %v3572_v27 = vpop.f32.mrb[44].mxu1 }
 0x4cb   :  { %v3578_v38 = vadd.f32 %v3572_v27, %v3470_v41  ;;  %v4435_v39 = vpop.f32.mrb[45].mxu1 }
 0x4cc   :  { %v3575_v25 = vpop.f32.mrb[46].mxu1 }
 0x4cd   :  { %v3586_v10 = vadd.f32 %v4255_v30, %v3578_v38  ;;  %v4436_v49 = vpop.f32.mrb[47].mxu1 }
 0x4cf   :  { %v3587_v62 = vmax.f32 %v3586_v10, 0.0 }
 0x4d1   :  { %v3588_v12 = vpack.c.bf16 %v3587_v62, %v3587_v62 }
 0x4d3   :  { %4454 = vmatmul.mubr.bf16.vlgmr.msra.gmra.mrb[48].mxu1 %v3588_v12 }
 0x4d4   :  { %4458 = vmatpush3.bf16.msra.mxu1 %v5102_v8  ;;  %4473 = vmatprep.mubr.msk.bf16.mxu1 %vm5116_vm1, %v5115_v31 }
 0x4d5   :  { %4459 = vmatprep.subr.bf16.mxu1 %v5115_v31 }
 0x4d8   :  { %4460 = vmatpush3.bf16.msra.mxu1 %v5103_v34 }
 0x4d9   :  { %4461 = vmatprep.subr.bf16.mxu1 %v5115_v31 }
 0x4dc   :  { %4462 = vmatpush3.bf16.msra.mxu1 %v5104_v17 }
 0x4dd   :  { %4463 = vmatprep.subr.bf16.mxu1 %v5115_v31 }
 0x4e0   :  { %4464 = vmatpush3.bf16.msra.mxu1 %v5105_v35 }
 0x4e1   :  { %4465 = vmatprep.subr.bf16.mxu1 %v5115_v31 }
 0x4e4   :  { %4466 = vmatpush3.bf16.msra.mxu1 %v5106_v37 }
 0x4e5   :  { %4467 = vmatprep.subr.bf16.mxu1 %v5115_v31 }
 0x4e8   :  { %4468 = vmatpush3.bf16.msra.mxu1 %v5107_v36 }
 0x4e9   :  { %4469 = vmatprep.subr.bf16.mxu1 %v5115_v31 }
 0x4ec   :  { %4470 = vmatpush3.bf16.msra.mxu1 %v5108_v44 }
 0x4ed   :  { %4471 = vmatprep.subr.bf16.mxu1 %v5115_v31  ;;  %v4265_v31 = vld [vmem:[%s6453_s10] ss:$0 sm:$0xff] }
 0x4f0   :  { %4472 = vmatpush3.bf16.msra.mxu1 %v5109_v47 }
 0x5a6   :  { %v3694_v52 = vpop.f32.mrb[48].mxu1 }
 0x5a7   :  { %v3695_v53 = vadd.f32 %v4256_v48, %v3694_v52  ;;  %v4455_v56 = vpop.f32.mrb[49].mxu1 }
 0x5a8   :  { %v3697_v29 = vpop.f32.mrb[50].mxu1 }
 0x5a9   :  { %v3700_v57 = vmax.f32 %v3695_v53, 0.0  ;;  %v4456_v58 = vpop.f32.mrb[51].mxu1 }
 0x5ab   :  { %v3701_v59 = vpack.c.bf16 %v3700_v57, %v3700_v57 }
 0x5ad   :  { %4474 = vmatmul.mubr.bf16.vlgmr.msra.gmra.mrb[52].mxu1 %v3701_v59 }
 0x680   :  { %v3807_v61 = vpop.f32.mrb[52].mxu1 }
 0x681   :  { %v3808_v0 = vadd.f32 %v4265_v31, %v3807_v61  ;;  %v4475_v50 = vpop.f32.mrb[53].mxu1 }
 0x682   :  { %v3810_v3 = vpop.f32.mrb[54].mxu1 }
 0x683   :  { %v4476_v4 = vpop.f32.mrb[55].mxu1  ;;  %v3816_v32 = vsel %vm3815_vm2, %v3808_v0, -1e+30 }
 0x684   :  { %3817 = vmax.xlane.f32.xlu0 %v3816_v32 }
 0x711   :  { %v3818_v5 = vpop.xlane.xlu0 %3817 }
 0x712   :  { %v3819_v63 = vsub.f32 %v3816_v32, %v3818_v5 }
 0x714   :  { %v3820_v7 = vmul.f32 1.442695, %v3819_v63 }
 0x716   :  { %5110 = vpow2.f32 %v3820_v7 }
 0x720   :  { %v5111_v6 = vpop.eup %5110 }
 0x721   :  { %3822 = vadd.xlane.f32.xlu0 %v5111_v6 }
 0x7ae   :  { %v3823_v9 = vpop.xlane.xlu0 %3822 }
 0x7af   :  { %5112 = vlog2.f32 %v3823_v9 }
 0x7b9   :  { %v5113_v40 = vpop.eup %5112 }
 0x7ba   :  { %v3825_v11 = vmul.f32 0.6931472, %v5113_v40 }
 0x7bc   :  { %v3826_v46 = vadd.f32 %v3825_v11, %v3818_v5 }
 0x7be   :  { %v3827_v18 = vsub.f32 %v3808_v0, %v3826_v46 }
 0x7c0   :  { %3828 = vst [vmem:[%s6454_s11] sm:$0xff] %v3827_v18 }

</bundles_post_ra>
